<compile_context>
chip_gen: v7x
topology: tpu7x:2x2x1
jax: 0.10.0
libtpu: 0.0.40
codegen_flags: <defaults>
</compile_context>

<pallas_src>
import math

import jax
import jax.numpy as jnp
from jax.experimental import pallas as pl
from jax.experimental.pallas import tpu as pltpu

# ----------------------------- model config ---------------------------------
VOCAB = 100
TYPE_VOCAB = 2
MAX_POS = 64
B, S, E = 2, 8, 32          # batch, seq, embed_size (small synthetic shapes)
NUM_HEADS = 4
HEAD_DIM = E // NUM_HEADS
FFN = 64
NUM_LAYERS = 2
DX_LABELS = 5               # dx_label_size
NER_LABELS = 7              # ner_label_size
HEAD_PAD = 128              # lane-dense padded width for the fused head output
LN_EPS = 1e-12              # BERT layernorm epsilon

_VMEM_SPEC = pl.BlockSpec(memory_space=pltpu.MemorySpace.VMEM)


# ----------------------------- small helpers --------------------------------
def _layernorm(x, gamma, beta):
    mu = jnp.mean(x, axis=-1, keepdims=True)
    var = jnp.mean((x - mu) ** 2, axis=-1, keepdims=True)
    return (x - mu) * jax.lax.rsqrt(var + LN_EPS) * gamma + beta


def _gelu(x):
    # tanh-approximate GELU (HF BERT default is exact erf-GELU; difference is
    # negligible here and tanh maps onto the EUP).
    c = math.sqrt(2.0 / math.pi)
    return 0.5 * x * (1.0 + jnp.tanh(c * (x + 0.044715 * x * x * x)))


# --------------------------- fused Pallas kernel ------------------------------
def bert_fused_kernel(h0_ref, mask_ref, emb_ln_ref,
                      wqkv_ref, bqkv_ref, wo_ref, wi_ref, wo2_ref,
                      bias_e_ref, bi_ref, whead_ref, bhead_ref,
                      out_ref):
    """Embedding LayerNorm + NUM_LAYERS transformer layers + fused dx/ner heads.

    Shapes (all f32, fully VMEM-resident -- total weights are ~50 KiB):
      h0_ref      [B*S, E]        summed token+pos+type embeddings (pre-LN)
      mask_ref    [B, S]          attention mask (1.0 keep, 0.0 pad)
      emb_ln_ref  [2, E]          embedding LayerNorm gamma / beta
      wqkv_ref    [L, E, 3E]      fused [Wq | Wk | Wv]
      bqkv_ref    [L, 1, 3E]
      wo_ref      [L, E, E]       attention output projection
      wi_ref      [L, E, FFN]     FFN in
      wo2_ref     [L, FFN, E]     FFN out
      bias_e_ref  [L, 6, E]       [bo, ln1_g, ln1_b, bo2, ln2_g, ln2_b]
      bi_ref      [L, 1, FFN]
      whead_ref   [E, 128]        cols [0:DX]=dx head, [DX:DX+NER]=ner head
      bhead_ref   [1, 128]
      out_ref     [B*S, 128]      lane-dense fused head logits
    """
    bs = B * S
    h = _layernorm(h0_ref[...], emb_ln_ref[0:1, :], emb_ln_ref[1:2, :])  # [BS, E]

    mask = mask_ref[...]                                   # [B, S]
    attn_bias = (mask - 1.0)[:, None, :] * 1e9             # [B, 1, S] additive key mask
    scale = 1.0 / math.sqrt(HEAD_DIM)

    for l in range(NUM_LAYERS):                            # static layer unroll
        be = bias_e_ref[l]                                 # [6, E]

        # ---- fused QKV projection: one [BS,E] x [E,3E] MXU pass ----
        qkv = (jnp.dot(h, wqkv_ref[l], preferred_element_type=jnp.float32)
               + bqkv_ref[l])                              # [BS, 3E]

        # ---- multi-head self-attention (static head loop, B-batched einsums) ----
        ctx_heads = []
        for hd in range(NUM_HEADS):
            off = hd * HEAD_DIM
            qh = qkv[:, off:off + HEAD_DIM].reshape(B, S, HEAD_DIM)
            kh = qkv[:, E + off:E + off + HEAD_DIM].reshape(B, S, HEAD_DIM)
            vh = qkv[:, 2 * E + off:2 * E + off + HEAD_DIM].reshape(B, S, HEAD_DIM)

            s = jnp.einsum('bqd,bkd->bqk', qh, kh,
                           preferred_element_type=jnp.float32) * scale
            s = s + attn_bias
            p = jnp.exp(s - jnp.max(s, axis=-1, keepdims=True))
            # divide -> EUP reciprocal (free slot alongside the exp)
            p = p * pl.reciprocal(jnp.sum(p, axis=-1, keepdims=True), approx=True)
            ctx_h = jnp.einsum('bqk,bkd->bqd', p, vh,
                               preferred_element_type=jnp.float32)
            ctx_heads.append(ctx_h.reshape(bs, HEAD_DIM))

        ctx = jnp.concatenate(ctx_heads, axis=-1)          # [BS, E]

        # ---- single full-width output projection ----
        attn_out = (jnp.dot(ctx, wo_ref[l], preferred_element_type=jnp.float32)
                    + be[0:1])
        h = _layernorm(h + attn_out, be[1:2], be[2:3])

        # ---- FFN ----
        ff = (jnp.dot(h, wi_ref[l], preferred_element_type=jnp.float32)
              + bi_ref[l])
        ff = _gelu(ff)
        ff = (jnp.dot(ff, wo2_ref[l], preferred_element_type=jnp.float32)
              + be[3:4])
        h = _layernorm(h + ff, be[4:5], be[5:6])

    # ---- fused dx + ner heads, lane-dense padded output ----
    # dx head is computed for every token; the wrapper keeps only the CLS rows
    # (identical result for those rows), so the store stays a full 128-lane slab.
    out_ref[...] = (jnp.dot(h, whead_ref[...], preferred_element_type=jnp.float32)
                    + bhead_ref[...])


# ----------------------------- wrapper ----------------------------------------
def run_fused_bert(h0, mask, p):
    args = (h0, mask, p['emb_ln'], p['wqkv'], p['bqkv'], p['wo'], p['wi'],
            p['wo2'], p['bias_e'], p['bi'], p['whead'], p['bhead'])
    return pl.pallas_call(
        bert_fused_kernel,
        out_shape=jax.ShapeDtypeStruct((B * S, HEAD_PAD), jnp.float32),
        in_specs=[_VMEM_SPEC] * len(args),
        out_specs=_VMEM_SPEC,
    )(*args)
    # TODO(synk): for real BERT shapes (S=512, E=768, FFN=3072) this no-grid,
    # full-array-in-VMEM design must switch to sequence-tiled BlockSpecs with a
    # "parallel" batch axis (v7x dual-TC) and an explicit vmem_limit_bytes.


# ----------------------------- parameters ------------------------------------
def init_all_params(key):
    keys = iter(jax.random.split(key, 64))

    def normal(shape):
        return 0.02 * jax.random.normal(next(keys), shape, jnp.float32)

    # fused QKV weight slab per layer: columns are [Wq | Wk | Wv]
    wqkv = jnp.stack([normal((E, 3 * E)) for _ in range(NUM_LAYERS)])   # [L, E, 3E]
    bqkv = jnp.zeros((NUM_LAYERS, 1, 3 * E), jnp.float32)
    wo = jnp.stack([normal((E, E)) for _ in range(NUM_LAYERS)])         # [L, E, E]
    wi = jnp.stack([normal((E, FFN)) for _ in range(NUM_LAYERS)])       # [L, E, FFN]
    wo2 = jnp.stack([normal((FFN, E)) for _ in range(NUM_LAYERS)])      # [L, FFN, E]
    bi = jnp.zeros((NUM_LAYERS, 1, FFN), jnp.float32)

    # packed E-wide per-layer vectors: [bo, ln1_g, ln1_b, bo2, ln2_g, ln2_b]
    bias_e_one = jnp.stack([
        jnp.zeros((E,), jnp.float32), jnp.ones((E,), jnp.float32),
        jnp.zeros((E,), jnp.float32), jnp.zeros((E,), jnp.float32),
        jnp.ones((E,), jnp.float32), jnp.zeros((E,), jnp.float32)])
    bias_e = jnp.stack([bias_e_one] * NUM_LAYERS)                       # [L, 6, E]

    # both heads fused into one lane-dense slab: cols [0:DX]=dx, [DX:DX+NER]=ner
    wdx = normal((E, DX_LABELS))
    wner = normal((E, NER_LABELS))
    whead = jnp.zeros((E, HEAD_PAD), jnp.float32)
    whead = whead.at[:, :DX_LABELS].set(wdx)
    whead = whead.at[:, DX_LABELS:DX_LABELS + NER_LABELS].set(wner)
    bhead = jnp.zeros((1, HEAD_PAD), jnp.float32)

    emb_ln = jnp.stack([jnp.ones((E,), jnp.float32),
                        jnp.zeros((E,), jnp.float32)])                  # [2, E]

    return {
        'word_emb': normal((VOCAB, E)),
        'pos_emb': normal((MAX_POS, E)),
        'type_emb': normal((TYPE_VOCAB, E)),
        'emb_ln': emb_ln,
        'wqkv': wqkv, 'bqkv': bqkv, 'wo': wo, 'wi': wi, 'wo2': wo2,
        'bias_e': bias_e, 'bi': bi,
        'whead': whead, 'bhead': bhead,
    }


# ----------------------------- forward ----------------------------------------
def bert_diagnosis_ner_forward(params, input_ids, token_type_ids, attention_mask):
    # Embedding table gather stays in plain JAX (data-dependent gather is not
    # worth a manual Pallas DMA-gather at these shapes).
    we = params['word_emb'][input_ids]                     # [B, S, E]
    pe = params['pos_emb'][:S][None, :, :]                 # [1, S, E]
    te = params['type_emb'][token_type_ids]                # [B, S, E]
    h0 = (we + pe + te).reshape(B * S, E).astype(jnp.float32)

    logits = run_fused_bert(h0, attention_mask.astype(jnp.float32), params)
    logits = logits.reshape(B, S, HEAD_PAD)
    o_dx = logits[:, 0, :DX_LABELS]                        # dx head on the CLS token
    o_ner = logits[:, :, DX_LABELS:DX_LABELS + NER_LABELS]  # ner head on every token
    return o_dx, o_ner


# TODO(synk): calc_loss (cross-entropy with ignore_index, weighted sum) is not
# part of forward(); it is left out of the Pallas implementation.

if __name__ == "__main__":
    key = jax.random.PRNGKey(0)
    pkey, ids_key = jax.random.split(key)

    params = init_all_params(pkey)
    input_ids = jax.random.randint(ids_key, (B, S), 0, VOCAB, dtype=jnp.int32)
    token_type_ids = jnp.zeros((B, S), jnp.int32)
    attention_mask = jnp.ones((B, S), jnp.float32)

    o_dx, o_ner = bert_diagnosis_ner_forward(
        params, input_ids, token_type_ids, attention_mask)
    jax.block_until_ready((o_dx, o_ner))

    assert o_dx.shape == (B, DX_LABELS), o_dx.shape
    assert o_ner.shape == (B, S, NER_LABELS), o_ner.shape
    assert bool(jnp.all(jnp.isfinite(o_dx))) and bool(jnp.all(jnp.isfinite(o_ner)))
    print("KERNEL_OK")
</pallas_src>

<mosaic_0001>
module attributes {stable_mosaic.version = 11 : i64} {
  func.func @bert_fused_kernel(%arg0: memref<16x32xf32, #tpu.memory_space<vmem>>, %arg1: memref<2x8xf32, #tpu.memory_space<vmem>>, %arg2: memref<2x32xf32, #tpu.memory_space<vmem>>, %arg3: memref<2x32x96xf32, #tpu.memory_space<vmem>>, %arg4: memref<2x1x96xf32, #tpu.memory_space<vmem>>, %arg5: memref<2x32x32xf32, #tpu.memory_space<vmem>>, %arg6: memref<2x32x64xf32, #tpu.memory_space<vmem>>, %arg7: memref<2x64x32xf32, #tpu.memory_space<vmem>>, %arg8: memref<2x6x32xf32, #tpu.memory_space<vmem>>, %arg9: memref<2x1x64xf32, #tpu.memory_space<vmem>>, %arg10: memref<32x128xf32, #tpu.memory_space<vmem>>, %arg11: memref<1x128xf32, #tpu.memory_space<vmem>>, %arg12: memref<16x128xf32, #tpu.memory_space<vmem>>) attributes {dimension_semantics = [], scalar_prefetch = 0 : i64, scratch_operands = 0 : i64, tpu.core_type = #tpu.core_type<tc>} {
    %c0 = arith.constant 0 : index
    %c0_0 = arith.constant 0 : index
    %0 = vector.load %arg0[%c0, %c0_0] : memref<16x32xf32, #tpu.memory_space<vmem>>, vector<16x32xf32>
    %c0_1 = arith.constant 0 : index
    %c0_2 = arith.constant 0 : index
    %1 = vector.load %arg2[%c0_1, %c0_2] : memref<2x32xf32, #tpu.memory_space<vmem>>, vector<1x32xf32>
    %c1 = arith.constant 1 : index
    %c0_3 = arith.constant 0 : index
    %2 = vector.load %arg2[%c1, %c0_3] : memref<2x32xf32, #tpu.memory_space<vmem>>, vector<1x32xf32>
    %cst = arith.constant dense<0.000000e+00> : vector<16xf32>
    %3 = vector.multi_reduction <add>, %0, %cst [1] : vector<16x32xf32> to vector<16xf32>
    %4 = vector.shape_cast %3 : vector<16xf32> to vector<16x1xf32>
    %cst_4 = arith.constant 3.200000e+01 : f32
    %5 = vector.broadcast %cst_4 : f32 to vector<16x1xf32>
    %6 = arith.divf %4, %5 : vector<16x1xf32>
    %7 = vector.broadcast %6 : vector<16x1xf32> to vector<16x32xf32>
    %8 = arith.subf %0, %7 : vector<16x32xf32>
    %9 = arith.mulf %8, %8 : vector<16x32xf32>
    %cst_5 = arith.constant dense<0.000000e+00> : vector<16xf32>
    %10 = vector.multi_reduction <add>, %9, %cst_5 [1] : vector<16x32xf32> to vector<16xf32>
    %11 = vector.shape_cast %10 : vector<16xf32> to vector<16x1xf32>
    %cst_6 = arith.constant 3.200000e+01 : f32
    %12 = vector.broadcast %cst_6 : f32 to vector<16x1xf32>
    %13 = arith.divf %11, %12 : vector<16x1xf32>
    %14 = vector.broadcast %6 : vector<16x1xf32> to vector<16x32xf32>
    %15 = arith.subf %0, %14 : vector<16x32xf32>
    %cst_7 = arith.constant 9.99999996E-13 : f32
    %16 = vector.broadcast %cst_7 : f32 to vector<16x1xf32>
    %17 = arith.addf %13, %16 : vector<16x1xf32>
    %18 = math.rsqrt %17 : vector<16x1xf32>
    %19 = vector.broadcast %18 : vector<16x1xf32> to vector<16x32xf32>
    %20 = arith.mulf %15, %19 : vector<16x32xf32>
    %21 = vector.broadcast %1 : vector<1x32xf32> to vector<16x32xf32>
    %22 = arith.mulf %20, %21 : vector<16x32xf32>
    %23 = vector.broadcast %2 : vector<1x32xf32> to vector<16x32xf32>
    %24 = arith.addf %22, %23 : vector<16x32xf32>
    %c0_8 = arith.constant 0 : index
    %c0_9 = arith.constant 0 : index
    %25 = vector.load %arg1[%c0_8, %c0_9] : memref<2x8xf32, #tpu.memory_space<vmem>>, vector<2x8xf32>
    %cst_10 = arith.constant 1.000000e+00 : f32
    %26 = vector.broadcast %cst_10 : f32 to vector<2x8xf32>
    %27 = arith.subf %25, %26 : vector<2x8xf32>
    %28 = vector.shape_cast %27 : vector<2x8xf32> to vector<2x1x8xf32>
    %cst_11 = arith.constant 1.000000e+09 : f32
    %29 = vector.broadcast %cst_11 : f32 to vector<2x1x8xf32>
    %30 = arith.mulf %28, %29 : vector<2x1x8xf32>
    %c0_12 = arith.constant 0 : index
    %c0_13 = arith.constant 0 : index
    %c0_14 = arith.constant 0 : index
    %31 = vector.load %arg8[%c0_12, %c0_13, %c0_14] : memref<2x6x32xf32, #tpu.memory_space<vmem>>, vector<1x6x32xf32>
    %32 = vector.shape_cast %31 : vector<1x6x32xf32> to vector<6x32xf32>
    %c0_15 = arith.constant 0 : index
    %c0_16 = arith.constant 0 : index
    %c0_17 = arith.constant 0 : index
    %33 = vector.load %arg3[%c0_15, %c0_16, %c0_17] : memref<2x32x96xf32, #tpu.memory_space<vmem>>, vector<1x32x96xf32>
    %34 = vector.shape_cast %33 : vector<1x32x96xf32> to vector<32x96xf32>
    %cst_18 = arith.constant dense<0.000000e+00> : vector<16x96xf32>
    %35 = tpu.matmul %24, %34, %cst_18 {dimension_numbers = #tpu.dot_dimension_numbers<[1], [0], [0], [1], [0, 0, 1, 1], [], []>} : vector<16x32xf32>, vector<32x96xf32>, vector<16x96xf32> -> vector<16x96xf32>
    %c0_19 = arith.constant 0 : index
    %c0_20 = arith.constant 0 : index
    %c0_21 = arith.constant 0 : index
    %36 = vector.load %arg4[%c0_19, %c0_20, %c0_21] : memref<2x1x96xf32, #tpu.memory_space<vmem>>, vector<1x1x96xf32>
    %37 = vector.shape_cast %36 : vector<1x1x96xf32> to vector<1x96xf32>
    %38 = vector.broadcast %37 : vector<1x96xf32> to vector<16x96xf32>
    %39 = arith.addf %35, %38 : vector<16x96xf32>
    %40 = vector.extract_strided_slice %39 {offsets = [0, 0], sizes = [16, 8], strides = [1, 1]} : vector<16x96xf32> to vector<16x8xf32>
    %41 = vector.shape_cast %40 : vector<16x8xf32> to vector<2x8x8xf32>
    %42 = vector.extract_strided_slice %39 {offsets = [0, 32], sizes = [16, 8], strides = [1, 1]} : vector<16x96xf32> to vector<16x8xf32>
    %43 = vector.shape_cast %42 : vector<16x8xf32> to vector<2x8x8xf32>
    %44 = vector.extract_strided_slice %39 {offsets = [0, 64], sizes = [16, 8], strides = [1, 1]} : vector<16x96xf32> to vector<16x8xf32>
    %45 = vector.shape_cast %44 : vector<16x8xf32> to vector<2x8x8xf32>
    "tpu.trace_start"() <{level = 10 : i32, message = "bqd,bkd->bqk"}> : () -> ()
    %cst_22 = arith.constant dense<0.000000e+00> : vector<2x8x8xf32>
    %46 = tpu.matmul %41, %43, %cst_22 {dimension_numbers = #tpu.dot_dimension_numbers<[2], [2], [1], [1], [0, 0, 0, 1, 1, 1], [0], [0]>} : vector<2x8x8xf32>, vector<2x8x8xf32>, vector<2x8x8xf32> -> vector<2x8x8xf32>
    "tpu.trace_stop"() : () -> ()
    %cst_23 = arith.constant 0.353553385 : f32
    %47 = vector.broadcast %cst_23 : f32 to vector<2x8x8xf32>
    %48 = arith.mulf %46, %47 : vector<2x8x8xf32>
    %49 = vector.broadcast %30 : vector<2x1x8xf32> to vector<2x8x8xf32>
    %50 = arith.addf %48, %49 : vector<2x8x8xf32>
    %cst_24 = arith.constant dense<0xFF800000> : vector<2x8xf32>
    %51 = vector.multi_reduction <maximumf>, %50, %cst_24 [2] : vector<2x8x8xf32> to vector<2x8xf32>
    %52 = vector.shape_cast %51 : vector<2x8xf32> to vector<2x8x1xf32>
    %53 = vector.broadcast %52 : vector<2x8x1xf32> to vector<2x8x8xf32>
    %54 = arith.subf %50, %53 : vector<2x8x8xf32>
    %55 = math.exp %54 : vector<2x8x8xf32>
    %cst_25 = arith.constant dense<0.000000e+00> : vector<2x8xf32>
    %56 = vector.multi_reduction <add>, %55, %cst_25 [2] : vector<2x8x8xf32> to vector<2x8xf32>
    %57 = vector.shape_cast %56 : vector<2x8xf32> to vector<2x8x1xf32>
    %58 = tpu.reciprocal %57 {approx = true} : vector<2x8x1xf32> -> vector<2x8x1xf32>
    %59 = vector.broadcast %58 : vector<2x8x1xf32> to vector<2x8x8xf32>
    %60 = arith.mulf %55, %59 : vector<2x8x8xf32>
    "tpu.trace_start"() <{level = 10 : i32, message = "bqk,bkd->bqd"}> : () -> ()
    %cst_26 = arith.constant dense<0.000000e+00> : vector<2x8x8xf32>
    %61 = tpu.matmul %60, %45, %cst_26 {dimension_numbers = #tpu.dot_dimension_numbers<[2], [1], [1], [2], [0, 0, 0, 1, 1, 2], [0], [0]>} : vector<2x8x8xf32>, vector<2x8x8xf32>, vector<2x8x8xf32> -> vector<2x8x8xf32>
    "tpu.trace_stop"() : () -> ()
    %62 = vector.shape_cast %61 : vector<2x8x8xf32> to vector<16x8xf32>
    %63 = vector.extract_strided_slice %39 {offsets = [0, 8], sizes = [16, 8], strides = [1, 1]} : vector<16x96xf32> to vector<16x8xf32>
    %64 = vector.shape_cast %63 : vector<16x8xf32> to vector<2x8x8xf32>
    %65 = vector.extract_strided_slice %39 {offsets = [0, 40], sizes = [16, 8], strides = [1, 1]} : vector<16x96xf32> to vector<16x8xf32>
    %66 = vector.shape_cast %65 : vector<16x8xf32> to vector<2x8x8xf32>
    %67 = vector.extract_strided_slice %39 {offsets = [0, 72], sizes = [16, 8], strides = [1, 1]} : vector<16x96xf32> to vector<16x8xf32>
    %68 = vector.shape_cast %67 : vector<16x8xf32> to vector<2x8x8xf32>
    "tpu.trace_start"() <{level = 10 : i32, message = "bqd,bkd->bqk"}> : () -> ()
    %cst_27 = arith.constant dense<0.000000e+00> : vector<2x8x8xf32>
    %69 = tpu.matmul %64, %66, %cst_27 {dimension_numbers = #tpu.dot_dimension_numbers<[2], [2], [1], [1], [0, 0, 0, 1, 1, 1], [0], [0]>} : vector<2x8x8xf32>, vector<2x8x8xf32>, vector<2x8x8xf32> -> vector<2x8x8xf32>
    "tpu.trace_stop"() : () -> ()
    %cst_28 = arith.constant 0.353553385 : f32
    %70 = vector.broadcast %cst_28 : f32 to vector<2x8x8xf32>
    %71 = arith.mulf %69, %70 : vector<2x8x8xf32>
    %72 = vector.broadcast %30 : vector<2x1x8xf32> to vector<2x8x8xf32>
    %73 = arith.addf %71, %72 : vector<2x8x8xf32>
    %cst_29 = arith.constant dense<0xFF800000> : vector<2x8xf32>
    %74 = vector.multi_reduction <maximumf>, %73, %cst_29 [2] : vector<2x8x8xf32> to vector<2x8xf32>
    %75 = vector.shape_cast %74 : vector<2x8xf32> to vector<2x8x1xf32>
    %76 = vector.broadcast %75 : vector<2x8x1xf32> to vector<2x8x8xf32>
    %77 = arith.subf %73, %76 : vector<2x8x8xf32>
    %78 = math.exp %77 : vector<2x8x8xf32>
    %cst_30 = arith.constant dense<0.000000e+00> : vector<2x8xf32>
    %79 = vector.multi_reduction <add>, %78, %cst_30 [2] : vector<2x8x8xf32> to vector<2x8xf32>
    %80 = vector.shape_cast %79 : vector<2x8xf32> to vector<2x8x1xf32>
    %81 = tpu.reciprocal %80 {approx = true} : vector<2x8x1xf32> -> vector<2x8x1xf32>
    %82 = vector.broadcast %81 : vector<2x8x1xf32> to vector<2x8x8xf32>
    %83 = arith.mulf %78, %82 : vector<2x8x8xf32>
    "tpu.trace_start"() <{level = 10 : i32, message = "bqk,bkd->bqd"}> : () -> ()
    %cst_31 = arith.constant dense<0.000000e+00> : vector<2x8x8xf32>
    %84 = tpu.matmul %83, %68, %cst_31 {dimension_numbers = #tpu.dot_dimension_numbers<[2], [1], [1], [2], [0, 0, 0, 1, 1, 2], [0], [0]>} : vector<2x8x8xf32>, vector<2x8x8xf32>, vector<2x8x8xf32> -> vector<2x8x8xf32>
    "tpu.trace_stop"() : () -> ()
    %85 = vector.shape_cast %84 : vector<2x8x8xf32> to vector<16x8xf32>
    %86 = vector.extract_strided_slice %39 {offsets = [0, 16], sizes = [16, 8], strides = [1, 1]} : vector<16x96xf32> to vector<16x8xf32>
    %87 = vector.shape_cast %86 : vector<16x8xf32> to vector<2x8x8xf32>
    %88 = vector.extract_strided_slice %39 {offsets = [0, 48], sizes = [16, 8], strides = [1, 1]} : vector<16x96xf32> to vector<16x8xf32>
    %89 = vector.shape_cast %88 : vector<16x8xf32> to vector<2x8x8xf32>
    %90 = vector.extract_strided_slice %39 {offsets = [0, 80], sizes = [16, 8], strides = [1, 1]} : vector<16x96xf32> to vector<16x8xf32>
    %91 = vector.shape_cast %90 : vector<16x8xf32> to vector<2x8x8xf32>
    "tpu.trace_start"() <{level = 10 : i32, message = "bqd,bkd->bqk"}> : () -> ()
    %cst_32 = arith.constant dense<0.000000e+00> : vector<2x8x8xf32>
    %92 = tpu.matmul %87, %89, %cst_32 {dimension_numbers = #tpu.dot_dimension_numbers<[2], [2], [1], [1], [0, 0, 0, 1, 1, 1], [0], [0]>} : vector<2x8x8xf32>, vector<2x8x8xf32>, vector<2x8x8xf32> -> vector<2x8x8xf32>
    "tpu.trace_stop"() : () -> ()
    %cst_33 = arith.constant 0.353553385 : f32
    %93 = vector.broadcast %cst_33 : f32 to vector<2x8x8xf32>
    %94 = arith.mulf %92, %93 : vector<2x8x8xf32>
    %95 = vector.broadcast %30 : vector<2x1x8xf32> to vector<2x8x8xf32>
    %96 = arith.addf %94, %95 : vector<2x8x8xf32>
    %cst_34 = arith.constant dense<0xFF800000> : vector<2x8xf32>
    %97 = vector.multi_reduction <maximumf>, %96, %cst_34 [2] : vector<2x8x8xf32> to vector<2x8xf32>
    %98 = vector.shape_cast %97 : vector<2x8xf32> to vector<2x8x1xf32>
    %99 = vector.broadcast %98 : vector<2x8x1xf32> to vector<2x8x8xf32>
    %100 = arith.subf %96, %99 : vector<2x8x8xf32>
    %101 = math.exp %100 : vector<2x8x8xf32>
    %cst_35 = arith.constant dense<0.000000e+00> : vector<2x8xf32>
    %102 = vector.multi_reduction <add>, %101, %cst_35 [2] : vector<2x8x8xf32> to vector<2x8xf32>
    %103 = vector.shape_cast %102 : vector<2x8xf32> to vector<2x8x1xf32>
    %104 = tpu.reciprocal %103 {approx = true} : vector<2x8x1xf32> -> vector<2x8x1xf32>
    %105 = vector.broadcast %104 : vector<2x8x1xf32> to vector<2x8x8xf32>
    %106 = arith.mulf %101, %105 : vector<2x8x8xf32>
    "tpu.trace_start"() <{level = 10 : i32, message = "bqk,bkd->bqd"}> : () -> ()
    %cst_36 = arith.constant dense<0.000000e+00> : vector<2x8x8xf32>
    %107 = tpu.matmul %106, %91, %cst_36 {dimension_numbers = #tpu.dot_dimension_numbers<[2], [1], [1], [2], [0, 0, 0, 1, 1, 2], [0], [0]>} : vector<2x8x8xf32>, vector<2x8x8xf32>, vector<2x8x8xf32> -> vector<2x8x8xf32>
    "tpu.trace_stop"() : () -> ()
    %108 = vector.shape_cast %107 : vector<2x8x8xf32> to vector<16x8xf32>
    %109 = vector.extract_strided_slice %39 {offsets = [0, 24], sizes = [16, 8], strides = [1, 1]} : vector<16x96xf32> to vector<16x8xf32>
    %110 = vector.shape_cast %109 : vector<16x8xf32> to vector<2x8x8xf32>
    %111 = vector.extract_strided_slice %39 {offsets = [0, 56], sizes = [16, 8], strides = [1, 1]} : vector<16x96xf32> to vector<16x8xf32>
    %112 = vector.shape_cast %111 : vector<16x8xf32> to vector<2x8x8xf32>
    %113 = vector.extract_strided_slice %39 {offsets = [0, 88], sizes = [16, 8], strides = [1, 1]} : vector<16x96xf32> to vector<16x8xf32>
    %114 = vector.shape_cast %113 : vector<16x8xf32> to vector<2x8x8xf32>
    "tpu.trace_start"() <{level = 10 : i32, message = "bqd,bkd->bqk"}> : () -> ()
    %cst_37 = arith.constant dense<0.000000e+00> : vector<2x8x8xf32>
    %115 = tpu.matmul %110, %112, %cst_37 {dimension_numbers = #tpu.dot_dimension_numbers<[2], [2], [1], [1], [0, 0, 0, 1, 1, 1], [0], [0]>} : vector<2x8x8xf32>, vector<2x8x8xf32>, vector<2x8x8xf32> -> vector<2x8x8xf32>
    "tpu.trace_stop"() : () -> ()
    %cst_38 = arith.constant 0.353553385 : f32
    %116 = vector.broadcast %cst_38 : f32 to vector<2x8x8xf32>
    %117 = arith.mulf %115, %116 : vector<2x8x8xf32>
    %118 = vector.broadcast %30 : vector<2x1x8xf32> to vector<2x8x8xf32>
    %119 = arith.addf %117, %118 : vector<2x8x8xf32>
    %cst_39 = arith.constant dense<0xFF800000> : vector<2x8xf32>
    %120 = vector.multi_reduction <maximumf>, %119, %cst_39 [2] : vector<2x8x8xf32> to vector<2x8xf32>
    %121 = vector.shape_cast %120 : vector<2x8xf32> to vector<2x8x1xf32>
    %122 = vector.broadcast %121 : vector<2x8x1xf32> to vector<2x8x8xf32>
    %123 = arith.subf %119, %122 : vector<2x8x8xf32>
    %124 = math.exp %123 : vector<2x8x8xf32>
    %cst_40 = arith.constant dense<0.000000e+00> : vector<2x8xf32>
    %125 = vector.multi_reduction <add>, %124, %cst_40 [2] : vector<2x8x8xf32> to vector<2x8xf32>
    %126 = vector.shape_cast %125 : vector<2x8xf32> to vector<2x8x1xf32>
    %127 = tpu.reciprocal %126 {approx = true} : vector<2x8x1xf32> -> vector<2x8x1xf32>
    %128 = vector.broadcast %127 : vector<2x8x1xf32> to vector<2x8x8xf32>
    %129 = arith.mulf %124, %128 : vector<2x8x8xf32>
    "tpu.trace_start"() <{level = 10 : i32, message = "bqk,bkd->bqd"}> : () -> ()
    %cst_41 = arith.constant dense<0.000000e+00> : vector<2x8x8xf32>
    %130 = tpu.matmul %129, %114, %cst_41 {dimension_numbers = #tpu.dot_dimension_numbers<[2], [1], [1], [2], [0, 0, 0, 1, 1, 2], [0], [0]>} : vector<2x8x8xf32>, vector<2x8x8xf32>, vector<2x8x8xf32> -> vector<2x8x8xf32>
    "tpu.trace_stop"() : () -> ()
    %131 = vector.shape_cast %130 : vector<2x8x8xf32> to vector<16x8xf32>
    %132 = tpu.concatenate %62, %85, %108, %131 in 1 : vector<16x8xf32>, vector<16x8xf32>, vector<16x8xf32>, vector<16x8xf32> -> vector<16x32xf32>
    %c0_42 = arith.constant 0 : index
    %c0_43 = arith.constant 0 : index
    %c0_44 = arith.constant 0 : index
    %133 = vector.load %arg5[%c0_42, %c0_43, %c0_44] : memref<2x32x32xf32, #tpu.memory_space<vmem>>, vector<1x32x32xf32>
    %134 = vector.shape_cast %133 : vector<1x32x32xf32> to vector<32x32xf32>
    %cst_45 = arith.constant dense<0.000000e+00> : vector<16x32xf32>
    %135 = tpu.matmul %132, %134, %cst_45 {dimension_numbers = #tpu.dot_dimension_numbers<[1], [0], [0], [1], [0, 0, 1, 1], [], []>} : vector<16x32xf32>, vector<32x32xf32>, vector<16x32xf32> -> vector<16x32xf32>
    %136 = vector.extract_strided_slice %32 {offsets = [0, 0], sizes = [1, 32], strides = [1, 1]} : vector<6x32xf32> to vector<1x32xf32>
    %137 = vector.broadcast %136 : vector<1x32xf32> to vector<16x32xf32>
    %138 = arith.addf %135, %137 : vector<16x32xf32>
    %139 = arith.addf %24, %138 : vector<16x32xf32>
    %140 = vector.extract_strided_slice %32 {offsets = [1, 0], sizes = [1, 32], strides = [1, 1]} : vector<6x32xf32> to vector<1x32xf32>
    %141 = vector.extract_strided_slice %32 {offsets = [2, 0], sizes = [1, 32], strides = [1, 1]} : vector<6x32xf32> to vector<1x32xf32>
    %cst_46 = arith.constant dense<0.000000e+00> : vector<16xf32>
    %142 = vector.multi_reduction <add>, %139, %cst_46 [1] : vector<16x32xf32> to vector<16xf32>
    %143 = vector.shape_cast %142 : vector<16xf32> to vector<16x1xf32>
    %cst_47 = arith.constant 3.200000e+01 : f32
    %144 = vector.broadcast %cst_47 : f32 to vector<16x1xf32>
    %145 = arith.divf %143, %144 : vector<16x1xf32>
    %146 = vector.broadcast %145 : vector<16x1xf32> to vector<16x32xf32>
    %147 = arith.subf %139, %146 : vector<16x32xf32>
    %148 = arith.mulf %147, %147 : vector<16x32xf32>
    %cst_48 = arith.constant dense<0.000000e+00> : vector<16xf32>
    %149 = vector.multi_reduction <add>, %148, %cst_48 [1] : vector<16x32xf32> to vector<16xf32>
    %150 = vector.shape_cast %149 : vector<16xf32> to vector<16x1xf32>
    %cst_49 = arith.constant 3.200000e+01 : f32
    %151 = vector.broadcast %cst_49 : f32 to vector<16x1xf32>
    %152 = arith.divf %150, %151 : vector<16x1xf32>
    %153 = vector.broadcast %145 : vector<16x1xf32> to vector<16x32xf32>
    %154 = arith.subf %139, %153 : vector<16x32xf32>
    %cst_50 = arith.constant 9.99999996E-13 : f32
    %155 = vector.broadcast %cst_50 : f32 to vector<16x1xf32>
    %156 = arith.addf %152, %155 : vector<16x1xf32>
    %157 = math.rsqrt %156 : vector<16x1xf32>
    %158 = vector.broadcast %157 : vector<16x1xf32> to vector<16x32xf32>
    %159 = arith.mulf %154, %158 : vector<16x32xf32>
    %160 = vector.broadcast %140 : vector<1x32xf32> to vector<16x32xf32>
    %161 = arith.mulf %159, %160 : vector<16x32xf32>
    %162 = vector.broadcast %141 : vector<1x32xf32> to vector<16x32xf32>
    %163 = arith.addf %161, %162 : vector<16x32xf32>
    %c0_51 = arith.constant 0 : index
    %c0_52 = arith.constant 0 : index
    %c0_53 = arith.constant 0 : index
    %164 = vector.load %arg6[%c0_51, %c0_52, %c0_53] : memref<2x32x64xf32, #tpu.memory_space<vmem>>, vector<1x32x64xf32>
    %165 = vector.shape_cast %164 : vector<1x32x64xf32> to vector<32x64xf32>
    %cst_54 = arith.constant dense<0.000000e+00> : vector<16x64xf32>
    %166 = tpu.matmul %163, %165, %cst_54 {dimension_numbers = #tpu.dot_dimension_numbers<[1], [0], [0], [1], [0, 0, 1, 1], [], []>} : vector<16x32xf32>, vector<32x64xf32>, vector<16x64xf32> -> vector<16x64xf32>
    %c0_55 = arith.constant 0 : index
    %c0_56 = arith.constant 0 : index
    %c0_57 = arith.constant 0 : index
    %167 = vector.load %arg9[%c0_55, %c0_56, %c0_57] : memref<2x1x64xf32, #tpu.memory_space<vmem>>, vector<1x1x64xf32>
    %168 = vector.shape_cast %167 : vector<1x1x64xf32> to vector<1x64xf32>
    %169 = vector.broadcast %168 : vector<1x64xf32> to vector<16x64xf32>
    %170 = arith.addf %166, %169 : vector<16x64xf32>
    %cst_58 = arith.constant 5.000000e-01 : f32
    %171 = vector.broadcast %cst_58 : f32 to vector<16x64xf32>
    %172 = arith.mulf %171, %170 : vector<16x64xf32>
    %cst_59 = arith.constant 4.471500e-02 : f32
    %173 = vector.broadcast %cst_59 : f32 to vector<16x64xf32>
    %174 = arith.mulf %173, %170 : vector<16x64xf32>
    %175 = arith.mulf %174, %170 : vector<16x64xf32>
    %176 = arith.mulf %175, %170 : vector<16x64xf32>
    %177 = arith.addf %170, %176 : vector<16x64xf32>
    %cst_60 = arith.constant 0.797884583 : f32
    %178 = vector.broadcast %cst_60 : f32 to vector<16x64xf32>
    %179 = arith.mulf %178, %177 : vector<16x64xf32>
    %180 = math.tanh %179 : vector<16x64xf32>
    %cst_61 = arith.constant 1.000000e+00 : f32
    %181 = vector.broadcast %cst_61 : f32 to vector<16x64xf32>
    %182 = arith.addf %181, %180 : vector<16x64xf32>
    %183 = arith.mulf %172, %182 : vector<16x64xf32>
    %c0_62 = arith.constant 0 : index
    %c0_63 = arith.constant 0 : index
    %c0_64 = arith.constant 0 : index
    %184 = vector.load %arg7[%c0_62, %c0_63, %c0_64] : memref<2x64x32xf32, #tpu.memory_space<vmem>>, vector<1x64x32xf32>
    %185 = vector.shape_cast %184 : vector<1x64x32xf32> to vector<64x32xf32>
    %cst_65 = arith.constant dense<0.000000e+00> : vector<16x32xf32>
    %186 = tpu.matmul %183, %185, %cst_65 {dimension_numbers = #tpu.dot_dimension_numbers<[1], [0], [0], [1], [0, 0, 1, 1], [], []>} : vector<16x64xf32>, vector<64x32xf32>, vector<16x32xf32> -> vector<16x32xf32>
    %187 = vector.extract_strided_slice %32 {offsets = [3, 0], sizes = [1, 32], strides = [1, 1]} : vector<6x32xf32> to vector<1x32xf32>
    %188 = vector.broadcast %187 : vector<1x32xf32> to vector<16x32xf32>
    %189 = arith.addf %186, %188 : vector<16x32xf32>
    %190 = arith.addf %163, %189 : vector<16x32xf32>
    %191 = vector.extract_strided_slice %32 {offsets = [4, 0], sizes = [1, 32], strides = [1, 1]} : vector<6x32xf32> to vector<1x32xf32>
    %192 = vector.extract_strided_slice %32 {offsets = [5, 0], sizes = [1, 32], strides = [1, 1]} : vector<6x32xf32> to vector<1x32xf32>
    %cst_66 = arith.constant dense<0.000000e+00> : vector<16xf32>
    %193 = vector.multi_reduction <add>, %190, %cst_66 [1] : vector<16x32xf32> to vector<16xf32>
    %194 = vector.shape_cast %193 : vector<16xf32> to vector<16x1xf32>
    %cst_67 = arith.constant 3.200000e+01 : f32
    %195 = vector.broadcast %cst_67 : f32 to vector<16x1xf32>
    %196 = arith.divf %194, %195 : vector<16x1xf32>
    %197 = vector.broadcast %196 : vector<16x1xf32> to vector<16x32xf32>
    %198 = arith.subf %190, %197 : vector<16x32xf32>
    %199 = arith.mulf %198, %198 : vector<16x32xf32>
    %cst_68 = arith.constant dense<0.000000e+00> : vector<16xf32>
    %200 = vector.multi_reduction <add>, %199, %cst_68 [1] : vector<16x32xf32> to vector<16xf32>
    %201 = vector.shape_cast %200 : vector<16xf32> to vector<16x1xf32>
    %cst_69 = arith.constant 3.200000e+01 : f32
    %202 = vector.broadcast %cst_69 : f32 to vector<16x1xf32>
    %203 = arith.divf %201, %202 : vector<16x1xf32>
    %204 = vector.broadcast %196 : vector<16x1xf32> to vector<16x32xf32>
    %205 = arith.subf %190, %204 : vector<16x32xf32>
    %cst_70 = arith.constant 9.99999996E-13 : f32
    %206 = vector.broadcast %cst_70 : f32 to vector<16x1xf32>
    %207 = arith.addf %203, %206 : vector<16x1xf32>
    %208 = math.rsqrt %207 : vector<16x1xf32>
    %209 = vector.broadcast %208 : vector<16x1xf32> to vector<16x32xf32>
    %210 = arith.mulf %205, %209 : vector<16x32xf32>
    %211 = vector.broadcast %191 : vector<1x32xf32> to vector<16x32xf32>
    %212 = arith.mulf %210, %211 : vector<16x32xf32>
    %213 = vector.broadcast %192 : vector<1x32xf32> to vector<16x32xf32>
    %214 = arith.addf %212, %213 : vector<16x32xf32>
    %c1_71 = arith.constant 1 : index
    %c0_72 = arith.constant 0 : index
    %c0_73 = arith.constant 0 : index
    %215 = vector.load %arg8[%c1_71, %c0_72, %c0_73] : memref<2x6x32xf32, #tpu.memory_space<vmem>>, vector<1x6x32xf32>
    %216 = vector.shape_cast %215 : vector<1x6x32xf32> to vector<6x32xf32>
    %c1_74 = arith.constant 1 : index
    %c0_75 = arith.constant 0 : index
    %c0_76 = arith.constant 0 : index
    %217 = vector.load %arg3[%c1_74, %c0_75, %c0_76] : memref<2x32x96xf32, #tpu.memory_space<vmem>>, vector<1x32x96xf32>
    %218 = vector.shape_cast %217 : vector<1x32x96xf32> to vector<32x96xf32>
    %cst_77 = arith.constant dense<0.000000e+00> : vector<16x96xf32>
    %219 = tpu.matmul %214, %218, %cst_77 {dimension_numbers = #tpu.dot_dimension_numbers<[1], [0], [0], [1], [0, 0, 1, 1], [], []>} : vector<16x32xf32>, vector<32x96xf32>, vector<16x96xf32> -> vector<16x96xf32>
    %c1_78 = arith.constant 1 : index
    %c0_79 = arith.constant 0 : index
    %c0_80 = arith.constant 0 : index
    %220 = vector.load %arg4[%c1_78, %c0_79, %c0_80] : memref<2x1x96xf32, #tpu.memory_space<vmem>>, vector<1x1x96xf32>
    %221 = vector.shape_cast %220 : vector<1x1x96xf32> to vector<1x96xf32>
    %222 = vector.broadcast %221 : vector<1x96xf32> to vector<16x96xf32>
    %223 = arith.addf %219, %222 : vector<16x96xf32>
    %224 = vector.extract_strided_slice %223 {offsets = [0, 0], sizes = [16, 8], strides = [1, 1]} : vector<16x96xf32> to vector<16x8xf32>
    %225 = vector.shape_cast %224 : vector<16x8xf32> to vector<2x8x8xf32>
    %226 = vector.extract_strided_slice %223 {offsets = [0, 32], sizes = [16, 8], strides = [1, 1]} : vector<16x96xf32> to vector<16x8xf32>
    %227 = vector.shape_cast %226 : vector<16x8xf32> to vector<2x8x8xf32>
    %228 = vector.extract_strided_slice %223 {offsets = [0, 64], sizes = [16, 8], strides = [1, 1]} : vector<16x96xf32> to vector<16x8xf32>
    %229 = vector.shape_cast %228 : vector<16x8xf32> to vector<2x8x8xf32>
    "tpu.trace_start"() <{level = 10 : i32, message = "bqd,bkd->bqk"}> : () -> ()
    %cst_81 = arith.constant dense<0.000000e+00> : vector<2x8x8xf32>
    %230 = tpu.matmul %225, %227, %cst_81 {dimension_numbers = #tpu.dot_dimension_numbers<[2], [2], [1], [1], [0, 0, 0, 1, 1, 1], [0], [0]>} : vector<2x8x8xf32>, vector<2x8x8xf32>, vector<2x8x8xf32> -> vector<2x8x8xf32>
    "tpu.trace_stop"() : () -> ()
    %cst_82 = arith.constant 0.353553385 : f32
    %231 = vector.broadcast %cst_82 : f32 to vector<2x8x8xf32>
    %232 = arith.mulf %230, %231 : vector<2x8x8xf32>
    %233 = vector.broadcast %30 : vector<2x1x8xf32> to vector<2x8x8xf32>
    %234 = arith.addf %232, %233 : vector<2x8x8xf32>
    %cst_83 = arith.constant dense<0xFF800000> : vector<2x8xf32>
    %235 = vector.multi_reduction <maximumf>, %234, %cst_83 [2] : vector<2x8x8xf32> to vector<2x8xf32>
    %236 = vector.shape_cast %235 : vector<2x8xf32> to vector<2x8x1xf32>
    %237 = vector.broadcast %236 : vector<2x8x1xf32> to vector<2x8x8xf32>
    %238 = arith.subf %234, %237 : vector<2x8x8xf32>
    %239 = math.exp %238 : vector<2x8x8xf32>
    %cst_84 = arith.constant dense<0.000000e+00> : vector<2x8xf32>
    %240 = vector.multi_reduction <add>, %239, %cst_84 [2] : vector<2x8x8xf32> to vector<2x8xf32>
    %241 = vector.shape_cast %240 : vector<2x8xf32> to vector<2x8x1xf32>
    %242 = tpu.reciprocal %241 {approx = true} : vector<2x8x1xf32> -> vector<2x8x1xf32>
    %243 = vector.broadcast %242 : vector<2x8x1xf32> to vector<2x8x8xf32>
    %244 = arith.mulf %239, %243 : vector<2x8x8xf32>
    "tpu.trace_start"() <{level = 10 : i32, message = "bqk,bkd->bqd"}> : () -> ()
    %cst_85 = arith.constant dense<0.000000e+00> : vector<2x8x8xf32>
    %245 = tpu.matmul %244, %229, %cst_85 {dimension_numbers = #tpu.dot_dimension_numbers<[2], [1], [1], [2], [0, 0, 0, 1, 1, 2], [0], [0]>} : vector<2x8x8xf32>, vector<2x8x8xf32>, vector<2x8x8xf32> -> vector<2x8x8xf32>
    "tpu.trace_stop"() : () -> ()
    %246 = vector.shape_cast %245 : vector<2x8x8xf32> to vector<16x8xf32>
    %247 = vector.extract_strided_slice %223 {offsets = [0, 8], sizes = [16, 8], strides = [1, 1]} : vector<16x96xf32> to vector<16x8xf32>
    %248 = vector.shape_cast %247 : vector<16x8xf32> to vector<2x8x8xf32>
    %249 = vector.extract_strided_slice %223 {offsets = [0, 40], sizes = [16, 8], strides = [1, 1]} : vector<16x96xf32> to vector<16x8xf32>
    %250 = vector.shape_cast %249 : vector<16x8xf32> to vector<2x8x8xf32>
    %251 = vector.extract_strided_slice %223 {offsets = [0, 72], sizes = [16, 8], strides = [1, 1]} : vector<16x96xf32> to vector<16x8xf32>
    %252 = vector.shape_cast %251 : vector<16x8xf32> to vector<2x8x8xf32>
    "tpu.trace_start"() <{level = 10 : i32, message = "bqd,bkd->bqk"}> : () -> ()
    %cst_86 = arith.constant dense<0.000000e+00> : vector<2x8x8xf32>
    %253 = tpu.matmul %248, %250, %cst_86 {dimension_numbers = #tpu.dot_dimension_numbers<[2], [2], [1], [1], [0, 0, 0, 1, 1, 1], [0], [0]>} : vector<2x8x8xf32>, vector<2x8x8xf32>, vector<2x8x8xf32> -> vector<2x8x8xf32>
    "tpu.trace_stop"() : () -> ()
    %cst_87 = arith.constant 0.353553385 : f32
    %254 = vector.broadcast %cst_87 : f32 to vector<2x8x8xf32>
    %255 = arith.mulf %253, %254 : vector<2x8x8xf32>
    %256 = vector.broadcast %30 : vector<2x1x8xf32> to vector<2x8x8xf32>
    %257 = arith.addf %255, %256 : vector<2x8x8xf32>
    %cst_88 = arith.constant dense<0xFF800000> : vector<2x8xf32>
    %258 = vector.multi_reduction <maximumf>, %257, %cst_88 [2] : vector<2x8x8xf32> to vector<2x8xf32>
    %259 = vector.shape_cast %258 : vector<2x8xf32> to vector<2x8x1xf32>
    %260 = vector.broadcast %259 : vector<2x8x1xf32> to vector<2x8x8xf32>
    %261 = arith.subf %257, %260 : vector<2x8x8xf32>
    %262 = math.exp %261 : vector<2x8x8xf32>
    %cst_89 = arith.constant dense<0.000000e+00> : vector<2x8xf32>
    %263 = vector.multi_reduction <add>, %262, %cst_89 [2] : vector<2x8x8xf32> to vector<2x8xf32>
    %264 = vector.shape_cast %263 : vector<2x8xf32> to vector<2x8x1xf32>
    %265 = tpu.reciprocal %264 {approx = true} : vector<2x8x1xf32> -> vector<2x8x1xf32>
    %266 = vector.broadcast %265 : vector<2x8x1xf32> to vector<2x8x8xf32>
    %267 = arith.mulf %262, %266 : vector<2x8x8xf32>
    "tpu.trace_start"() <{level = 10 : i32, message = "bqk,bkd->bqd"}> : () -> ()
    %cst_90 = arith.constant dense<0.000000e+00> : vector<2x8x8xf32>
    %268 = tpu.matmul %267, %252, %cst_90 {dimension_numbers = #tpu.dot_dimension_numbers<[2], [1], [1], [2], [0, 0, 0, 1, 1, 2], [0], [0]>} : vector<2x8x8xf32>, vector<2x8x8xf32>, vector<2x8x8xf32> -> vector<2x8x8xf32>
    "tpu.trace_stop"() : () -> ()
    %269 = vector.shape_cast %268 : vector<2x8x8xf32> to vector<16x8xf32>
    %270 = vector.extract_strided_slice %223 {offsets = [0, 16], sizes = [16, 8], strides = [1, 1]} : vector<16x96xf32> to vector<16x8xf32>
    %271 = vector.shape_cast %270 : vector<16x8xf32> to vector<2x8x8xf32>
    %272 = vector.extract_strided_slice %223 {offsets = [0, 48], sizes = [16, 8], strides = [1, 1]} : vector<16x96xf32> to vector<16x8xf32>
    %273 = vector.shape_cast %272 : vector<16x8xf32> to vector<2x8x8xf32>
    %274 = vector.extract_strided_slice %223 {offsets = [0, 80], sizes = [16, 8], strides = [1, 1]} : vector<16x96xf32> to vector<16x8xf32>
    %275 = vector.shape_cast %274 : vector<16x8xf32> to vector<2x8x8xf32>
    "tpu.trace_start"() <{level = 10 : i32, message = "bqd,bkd->bqk"}> : () -> ()
    %cst_91 = arith.constant dense<0.000000e+00> : vector<2x8x8xf32>
    %276 = tpu.matmul %271, %273, %cst_91 {dimension_numbers = #tpu.dot_dimension_numbers<[2], [2], [1], [1], [0, 0, 0, 1, 1, 1], [0], [0]>} : vector<2x8x8xf32>, vector<2x8x8xf32>, vector<2x8x8xf32> -> vector<2x8x8xf32>
    "tpu.trace_stop"() : () -> ()
    %cst_92 = arith.constant 0.353553385 : f32
    %277 = vector.broadcast %cst_92 : f32 to vector<2x8x8xf32>
    %278 = arith.mulf %276, %277 : vector<2x8x8xf32>
    %279 = vector.broadcast %30 : vector<2x1x8xf32> to vector<2x8x8xf32>
    %280 = arith.addf %278, %279 : vector<2x8x8xf32>
    %cst_93 = arith.constant dense<0xFF800000> : vector<2x8xf32>
    %281 = vector.multi_reduction <maximumf>, %280, %cst_93 [2] : vector<2x8x8xf32> to vector<2x8xf32>
    %282 = vector.shape_cast %281 : vector<2x8xf32> to vector<2x8x1xf32>
    %283 = vector.broadcast %282 : vector<2x8x1xf32> to vector<2x8x8xf32>
    %284 = arith.subf %280, %283 : vector<2x8x8xf32>
    %285 = math.exp %284 : vector<2x8x8xf32>
    %cst_94 = arith.constant dense<0.000000e+00> : vector<2x8xf32>
    %286 = vector.multi_reduction <add>, %285, %cst_94 [2] : vector<2x8x8xf32> to vector<2x8xf32>
    %287 = vector.shape_cast %286 : vector<2x8xf32> to vector<2x8x1xf32>
    %288 = tpu.reciprocal %287 {approx = true} : vector<2x8x1xf32> -> vector<2x8x1xf32>
    %289 = vector.broadcast %288 : vector<2x8x1xf32> to vector<2x8x8xf32>
    %290 = arith.mulf %285, %289 : vector<2x8x8xf32>
    "tpu.trace_start"() <{level = 10 : i32, message = "bqk,bkd->bqd"}> : () -> ()
    %cst_95 = arith.constant dense<0.000000e+00> : vector<2x8x8xf32>
    %291 = tpu.matmul %290, %275, %cst_95 {dimension_numbers = #tpu.dot_dimension_numbers<[2], [1], [1], [2], [0, 0, 0, 1, 1, 2], [0], [0]>} : vector<2x8x8xf32>, vector<2x8x8xf32>, vector<2x8x8xf32> -> vector<2x8x8xf32>
    "tpu.trace_stop"() : () -> ()
    %292 = vector.shape_cast %291 : vector<2x8x8xf32> to vector<16x8xf32>
    %293 = vector.extract_strided_slice %223 {offsets = [0, 24], sizes = [16, 8], strides = [1, 1]} : vector<16x96xf32> to vector<16x8xf32>
    %294 = vector.shape_cast %293 : vector<16x8xf32> to vector<2x8x8xf32>
    %295 = vector.extract_strided_slice %223 {offsets = [0, 56], sizes = [16, 8], strides = [1, 1]} : vector<16x96xf32> to vector<16x8xf32>
    %296 = vector.shape_cast %295 : vector<16x8xf32> to vector<2x8x8xf32>
    %297 = vector.extract_strided_slice %223 {offsets = [0, 88], sizes = [16, 8], strides = [1, 1]} : vector<16x96xf32> to vector<16x8xf32>
    %298 = vector.shape_cast %297 : vector<16x8xf32> to vector<2x8x8xf32>
    "tpu.trace_start"() <{level = 10 : i32, message = "bqd,bkd->bqk"}> : () -> ()
    %cst_96 = arith.constant dense<0.000000e+00> : vector<2x8x8xf32>
    %299 = tpu.matmul %294, %296, %cst_96 {dimension_numbers = #tpu.dot_dimension_numbers<[2], [2], [1], [1], [0, 0, 0, 1, 1, 1], [0], [0]>} : vector<2x8x8xf32>, vector<2x8x8xf32>, vector<2x8x8xf32> -> vector<2x8x8xf32>
    "tpu.trace_stop"() : () -> ()
    %cst_97 = arith.constant 0.353553385 : f32
    %300 = vector.broadcast %cst_97 : f32 to vector<2x8x8xf32>
    %301 = arith.mulf %299, %300 : vector<2x8x8xf32>
    %302 = vector.broadcast %30 : vector<2x1x8xf32> to vector<2x8x8xf32>
    %303 = arith.addf %301, %302 : vector<2x8x8xf32>
    %cst_98 = arith.constant dense<0xFF800000> : vector<2x8xf32>
    %304 = vector.multi_reduction <maximumf>, %303, %cst_98 [2] : vector<2x8x8xf32> to vector<2x8xf32>
    %305 = vector.shape_cast %304 : vector<2x8xf32> to vector<2x8x1xf32>
    %306 = vector.broadcast %305 : vector<2x8x1xf32> to vector<2x8x8xf32>
    %307 = arith.subf %303, %306 : vector<2x8x8xf32>
    %308 = math.exp %307 : vector<2x8x8xf32>
    %cst_99 = arith.constant dense<0.000000e+00> : vector<2x8xf32>
    %309 = vector.multi_reduction <add>, %308, %cst_99 [2] : vector<2x8x8xf32> to vector<2x8xf32>
    %310 = vector.shape_cast %309 : vector<2x8xf32> to vector<2x8x1xf32>
    %311 = tpu.reciprocal %310 {approx = true} : vector<2x8x1xf32> -> vector<2x8x1xf32>
    %312 = vector.broadcast %311 : vector<2x8x1xf32> to vector<2x8x8xf32>
    %313 = arith.mulf %308, %312 : vector<2x8x8xf32>
    "tpu.trace_start"() <{level = 10 : i32, message = "bqk,bkd->bqd"}> : () -> ()
    %cst_100 = arith.constant dense<0.000000e+00> : vector<2x8x8xf32>
    %314 = tpu.matmul %313, %298, %cst_100 {dimension_numbers = #tpu.dot_dimension_numbers<[2], [1], [1], [2], [0, 0, 0, 1, 1, 2], [0], [0]>} : vector<2x8x8xf32>, vector<2x8x8xf32>, vector<2x8x8xf32> -> vector<2x8x8xf32>
    "tpu.trace_stop"() : () -> ()
    %315 = vector.shape_cast %314 : vector<2x8x8xf32> to vector<16x8xf32>
    %316 = tpu.concatenate %246, %269, %292, %315 in 1 : vector<16x8xf32>, vector<16x8xf32>, vector<16x8xf32>, vector<16x8xf32> -> vector<16x32xf32>
    %c1_101 = arith.constant 1 : index
    %c0_102 = arith.constant 0 : index
    %c0_103 = arith.constant 0 : index
    %317 = vector.load %arg5[%c1_101, %c0_102, %c0_103] : memref<2x32x32xf32, #tpu.memory_space<vmem>>, vector<1x32x32xf32>
    %318 = vector.shape_cast %317 : vector<1x32x32xf32> to vector<32x32xf32>
    %cst_104 = arith.constant dense<0.000000e+00> : vector<16x32xf32>
    %319 = tpu.matmul %316, %318, %cst_104 {dimension_numbers = #tpu.dot_dimension_numbers<[1], [0], [0], [1], [0, 0, 1, 1], [], []>} : vector<16x32xf32>, vector<32x32xf32>, vector<16x32xf32> -> vector<16x32xf32>
    %320 = vector.extract_strided_slice %216 {offsets = [0, 0], sizes = [1, 32], strides = [1, 1]} : vector<6x32xf32> to vector<1x32xf32>
    %321 = vector.broadcast %320 : vector<1x32xf32> to vector<16x32xf32>
    %322 = arith.addf %319, %321 : vector<16x32xf32>
    %323 = arith.addf %214, %322 : vector<16x32xf32>
    %324 = vector.extract_strided_slice %216 {offsets = [1, 0], sizes = [1, 32], strides = [1, 1]} : vector<6x32xf32> to vector<1x32xf32>
    %325 = vector.extract_strided_slice %216 {offsets = [2, 0], sizes = [1, 32], strides = [1, 1]} : vector<6x32xf32> to vector<1x32xf32>
    %cst_105 = arith.constant dense<0.000000e+00> : vector<16xf32>
    %326 = vector.multi_reduction <add>, %323, %cst_105 [1] : vector<16x32xf32> to vector<16xf32>
    %327 = vector.shape_cast %326 : vector<16xf32> to vector<16x1xf32>
    %cst_106 = arith.constant 3.200000e+01 : f32
    %328 = vector.broadcast %cst_106 : f32 to vector<16x1xf32>
    %329 = arith.divf %327, %328 : vector<16x1xf32>
    %330 = vector.broadcast %329 : vector<16x1xf32> to vector<16x32xf32>
    %331 = arith.subf %323, %330 : vector<16x32xf32>
    %332 = arith.mulf %331, %331 : vector<16x32xf32>
    %cst_107 = arith.constant dense<0.000000e+00> : vector<16xf32>
    %333 = vector.multi_reduction <add>, %332, %cst_107 [1] : vector<16x32xf32> to vector<16xf32>
    %334 = vector.shape_cast %333 : vector<16xf32> to vector<16x1xf32>
    %cst_108 = arith.constant 3.200000e+01 : f32
    %335 = vector.broadcast %cst_108 : f32 to vector<16x1xf32>
    %336 = arith.divf %334, %335 : vector<16x1xf32>
    %337 = vector.broadcast %329 : vector<16x1xf32> to vector<16x32xf32>
    %338 = arith.subf %323, %337 : vector<16x32xf32>
    %cst_109 = arith.constant 9.99999996E-13 : f32
    %339 = vector.broadcast %cst_109 : f32 to vector<16x1xf32>
    %340 = arith.addf %336, %339 : vector<16x1xf32>
    %341 = math.rsqrt %340 : vector<16x1xf32>
    %342 = vector.broadcast %341 : vector<16x1xf32> to vector<16x32xf32>
    %343 = arith.mulf %338, %342 : vector<16x32xf32>
    %344 = vector.broadcast %324 : vector<1x32xf32> to vector<16x32xf32>
    %345 = arith.mulf %343, %344 : vector<16x32xf32>
    %346 = vector.broadcast %325 : vector<1x32xf32> to vector<16x32xf32>
    %347 = arith.addf %345, %346 : vector<16x32xf32>
    %c1_110 = arith.constant 1 : index
    %c0_111 = arith.constant 0 : index
    %c0_112 = arith.constant 0 : index
    %348 = vector.load %arg6[%c1_110, %c0_111, %c0_112] : memref<2x32x64xf32, #tpu.memory_space<vmem>>, vector<1x32x64xf32>
    %349 = vector.shape_cast %348 : vector<1x32x64xf32> to vector<32x64xf32>
    %cst_113 = arith.constant dense<0.000000e+00> : vector<16x64xf32>
    %350 = tpu.matmul %347, %349, %cst_113 {dimension_numbers = #tpu.dot_dimension_numbers<[1], [0], [0], [1], [0, 0, 1, 1], [], []>} : vector<16x32xf32>, vector<32x64xf32>, vector<16x64xf32> -> vector<16x64xf32>
    %c1_114 = arith.constant 1 : index
    %c0_115 = arith.constant 0 : index
    %c0_116 = arith.constant 0 : index
    %351 = vector.load %arg9[%c1_114, %c0_115, %c0_116] : memref<2x1x64xf32, #tpu.memory_space<vmem>>, vector<1x1x64xf32>
    %352 = vector.shape_cast %351 : vector<1x1x64xf32> to vector<1x64xf32>
    %353 = vector.broadcast %352 : vector<1x64xf32> to vector<16x64xf32>
    %354 = arith.addf %350, %353 : vector<16x64xf32>
    %cst_117 = arith.constant 5.000000e-01 : f32
    %355 = vector.broadcast %cst_117 : f32 to vector<16x64xf32>
    %356 = arith.mulf %355, %354 : vector<16x64xf32>
    %cst_118 = arith.constant 4.471500e-02 : f32
    %357 = vector.broadcast %cst_118 : f32 to vector<16x64xf32>
    %358 = arith.mulf %357, %354 : vector<16x64xf32>
    %359 = arith.mulf %358, %354 : vector<16x64xf32>
    %360 = arith.mulf %359, %354 : vector<16x64xf32>
    %361 = arith.addf %354, %360 : vector<16x64xf32>
    %cst_119 = arith.constant 0.797884583 : f32
    %362 = vector.broadcast %cst_119 : f32 to vector<16x64xf32>
    %363 = arith.mulf %362, %361 : vector<16x64xf32>
    %364 = math.tanh %363 : vector<16x64xf32>
    %cst_120 = arith.constant 1.000000e+00 : f32
    %365 = vector.broadcast %cst_120 : f32 to vector<16x64xf32>
    %366 = arith.addf %365, %364 : vector<16x64xf32>
    %367 = arith.mulf %356, %366 : vector<16x64xf32>
    %c1_121 = arith.constant 1 : index
    %c0_122 = arith.constant 0 : index
    %c0_123 = arith.constant 0 : index
    %368 = vector.load %arg7[%c1_121, %c0_122, %c0_123] : memref<2x64x32xf32, #tpu.memory_space<vmem>>, vector<1x64x32xf32>
    %369 = vector.shape_cast %368 : vector<1x64x32xf32> to vector<64x32xf32>
    %cst_124 = arith.constant dense<0.000000e+00> : vector<16x32xf32>
    %370 = tpu.matmul %367, %369, %cst_124 {dimension_numbers = #tpu.dot_dimension_numbers<[1], [0], [0], [1], [0, 0, 1, 1], [], []>} : vector<16x64xf32>, vector<64x32xf32>, vector<16x32xf32> -> vector<16x32xf32>
    %371 = vector.extract_strided_slice %216 {offsets = [3, 0], sizes = [1, 32], strides = [1, 1]} : vector<6x32xf32> to vector<1x32xf32>
    %372 = vector.broadcast %371 : vector<1x32xf32> to vector<16x32xf32>
    %373 = arith.addf %370, %372 : vector<16x32xf32>
    %374 = arith.addf %347, %373 : vector<16x32xf32>
    %375 = vector.extract_strided_slice %216 {offsets = [4, 0], sizes = [1, 32], strides = [1, 1]} : vector<6x32xf32> to vector<1x32xf32>
    %376 = vector.extract_strided_slice %216 {offsets = [5, 0], sizes = [1, 32], strides = [1, 1]} : vector<6x32xf32> to vector<1x32xf32>
    %cst_125 = arith.constant dense<0.000000e+00> : vector<16xf32>
    %377 = vector.multi_reduction <add>, %374, %cst_125 [1] : vector<16x32xf32> to vector<16xf32>
    %378 = vector.shape_cast %377 : vector<16xf32> to vector<16x1xf32>
    %cst_126 = arith.constant 3.200000e+01 : f32
    %379 = vector.broadcast %cst_126 : f32 to vector<16x1xf32>
    %380 = arith.divf %378, %379 : vector<16x1xf32>
    %381 = vector.broadcast %380 : vector<16x1xf32> to vector<16x32xf32>
    %382 = arith.subf %374, %381 : vector<16x32xf32>
    %383 = arith.mulf %382, %382 : vector<16x32xf32>
    %cst_127 = arith.constant dense<0.000000e+00> : vector<16xf32>
    %384 = vector.multi_reduction <add>, %383, %cst_127 [1] : vector<16x32xf32> to vector<16xf32>
    %385 = vector.shape_cast %384 : vector<16xf32> to vector<16x1xf32>
    %cst_128 = arith.constant 3.200000e+01 : f32
    %386 = vector.broadcast %cst_128 : f32 to vector<16x1xf32>
    %387 = arith.divf %385, %386 : vector<16x1xf32>
    %388 = vector.broadcast %380 : vector<16x1xf32> to vector<16x32xf32>
    %389 = arith.subf %374, %388 : vector<16x32xf32>
    %cst_129 = arith.constant 9.99999996E-13 : f32
    %390 = vector.broadcast %cst_129 : f32 to vector<16x1xf32>
    %391 = arith.addf %387, %390 : vector<16x1xf32>
    %392 = math.rsqrt %391 : vector<16x1xf32>
    %393 = vector.broadcast %392 : vector<16x1xf32> to vector<16x32xf32>
    %394 = arith.mulf %389, %393 : vector<16x32xf32>
    %395 = vector.broadcast %375 : vector<1x32xf32> to vector<16x32xf32>
    %396 = arith.mulf %394, %395 : vector<16x32xf32>
    %397 = vector.broadcast %376 : vector<1x32xf32> to vector<16x32xf32>
    %398 = arith.addf %396, %397 : vector<16x32xf32>
    %c0_130 = arith.constant 0 : index
    %c0_131 = arith.constant 0 : index
    %399 = vector.load %arg10[%c0_130, %c0_131] : memref<32x128xf32, #tpu.memory_space<vmem>>, vector<32x128xf32>
    %cst_132 = arith.constant dense<0.000000e+00> : vector<16x128xf32>
    %400 = tpu.matmul %398, %399, %cst_132 {dimension_numbers = #tpu.dot_dimension_numbers<[1], [0], [0], [1], [0, 0, 1, 1], [], []>} : vector<16x32xf32>, vector<32x128xf32>, vector<16x128xf32> -> vector<16x128xf32>
    %c0_133 = arith.constant 0 : index
    %c0_134 = arith.constant 0 : index
    %401 = vector.load %arg11[%c0_133, %c0_134] : memref<1x128xf32, #tpu.memory_space<vmem>>, vector<1x128xf32>
    %402 = vector.broadcast %401 : vector<1x128xf32> to vector<16x128xf32>
    %403 = arith.addf %400, %402 : vector<16x128xf32>
    %c0_135 = arith.constant 0 : index
    %c0_136 = arith.constant 0 : index
    %404 = vector.load %arg12[%c0_135, %c0_136] : memref<16x128xf32, #tpu.memory_space<vmem>>, vector<16x128xf32>
    tpu.vector_store %arg12[%c0_135, %c0_136], %403 {strides = array<i32>} : memref<16x128xf32, #tpu.memory_space<vmem>>, vector<16x128xf32>,
    return
  }
}

</mosaic_0001>

<bundles_post_ra>
// kernel: tpu_custom_call.1
= control target key start
LH: loop header
LB: loop body
LE: loop exit
PB: predicated region body
PF: predicated region fallthrough
CT: control target
= control target key end

     0   :  { %17 = vsyncpa [#allocation3], 0  ;;  %s5438_s0 = inlined_call_operand.hbm [shape: f32[16,32], index: 0, kind: input, shape index: {}]   ;;  %s5439_s1 = inlined_call_operand.vmem [shape: f32[2,8], index: 1, kind: input, shape index: {}]   ;;  %s5440_s2 = inlined_call_operand.hbm [shape: f32[2,32], index: 2, kind: input, shape index: {}]   ;;  %s5441_s3 = inlined_call_operand.vmem [shape: f32[2,32,96], index: 3, kind: input, shape index: {}]   ;;  %s5442_s4 = inlined_call_operand.vmem [shape: f32[2,1,96], index: 4, kind: input, shape index: {}]   ;;  %s5443_s5 = inlined_call_operand.vmem [shape: f32[2,32,32], index: 5, kind: input, shape index: {}]   ;;  %s5444_s6 = inlined_call_operand.vmem [shape: f32[2,32,64], index: 6, kind: input, shape index: {}]   ;;  %s5445_s7 = inlined_call_operand.vmem [shape: f32[2,64,32], index: 7, kind: input, shape index: {}]   ;;  %s5446_s8 = inlined_call_operand.vmem [shape: f32[2,6,32], index: 8, kind: input, shape index: {}]   ;;  %s5447_s9 = inlined_call_operand.vmem [shape: f32[2,1,64], index: 9, kind: input, shape index: {}]   ;;  %s5448_s10 = inlined_call_operand.vmem [shape: f32[32,128], index: 10, kind: input, shape index: {}]   ;;  %s5449_s11 = inlined_call_operand.vmem [shape: f32[1,128], index: 11, kind: input, shape index: {}]   ;;  %s5450_s12 = inlined_call_operand.hbm [shape: f32[16,128], index: 12, kind: output, shape index: {}]  }
   0x1   :  { %18 = vsyncpa [#allocation6], 0 }
   0x2   :  { %19 = vsyncpa [#allocation4], 0  ;;  %s4705_s21 = smov [#allocation2]   ;;  %s4633_s25 = scalar_lea.hbm %s5438_s0, 256 }
   0x3   :  { %s25_s22 = sshll.u32 %s4705_s21, 4  ;;  %p4634_p0 = scmp.ne.s32.totalorder %s5438_s0, %s4633_s25  ;;  %s26_s22 = int_to_ptr.vmem [resolvable:$true] %s25_s22 }
   0x4   :  { %p4637_p1 = scmp.lt.u32.totalorder %s4633_s25, %s5438_s0 }
   0x6   :  { %p4639_p2 = pnand %p4637_p1, %p4634_p0 }
   0x8   :  { %4642 = shalt.err (!%p4639_p2)
}
   0x9   :  { %s4643_s30 = scalar_lea.vmem %s26_s22, 256  ;;  %p4648_p4 = scmp.lt.s32.totalorder %s26_s22, %s26_s22 }
   0xa   :  { %p4644_p3 = scmp.ne.s32.totalorder %s26_s22, %s4643_s30  ;;  %p4649_p5 = scmp.lt.s32.totalorder %s4643_s30, %s4643_s30 }
   0xc   :  { %p4650_p6 = por %p4649_p5, %p4648_p4 }
   0xe   :  { %p4651_p7 = pnand %p4650_p6, %p4644_p3 }
  0x10   :  { %4654 = shalt.err (!%p4651_p7)
}
  0x11   :  { %s5451_s13 = smov 128   ;;  %s5456_s14 = smov 8  }
  0x12   :  { %31 = dma.hbm_to_vmem [thread:$0]  %s5438_s0, 256, %s26_s22, [#allocation3], %s5451_s13, %s5451_s13, %s5456_s14  }
  0x13   :  { %s4708_s17 = smov [#allocation5]   ;;  %s4655_s21 = scalar_lea.hbm %s5440_s2, 32 }
  0x14   :  { %s40_s18 = sshll.u32 %s4708_s17, 4  ;;  %p4656_p8 = scmp.ne.s32.totalorder %s5440_s2, %s4655_s21  ;;  %s41_s18 = int_to_ptr.vmem [resolvable:$true] %s40_s18 }
  0x15   :  { %p4659_p9 = scmp.lt.u32.totalorder %s4655_s21, %s5440_s2 }
  0x17   :  { %p4661_p10 = pnand %p4659_p9, %p4656_p8 }
  0x19   :  { %4664 = shalt.err (!%p4661_p10)
}
  0x1a   :  { %s4665_s27 = scalar_lea.vmem %s41_s18, 32  ;;  %p4670_p12 = scmp.lt.s32.totalorder %s41_s18, %s41_s18 }
  0x1b   :  { %p4666_p11 = scmp.ne.s32.totalorder %s41_s18, %s4665_s27  ;;  %p4671_p13 = scmp.lt.s32.totalorder %s4665_s27, %s4665_s27 }
  0x1d   :  { %p4672_p0 = por %p4671_p13, %p4670_p12 }
  0x1f   :  { %p4673_p1 = pnand %p4672_p0, %p4666_p11 }
  0x21   :  { %4676 = shalt.err (!%p4673_p1)
}
  0x22   :  { %43 = dma.hbm_to_vmem [thread:$0]  %s5440_s2, 32, %s41_s18, [#allocation6]  }
  0x23   :  { %4699 = dma.done.wait [#allocation3], 256  }
  0x24   :  { %4700 = vsyncadd [#allocation3], 4294967040 }
  0x25   :  { %4701 = dma.done.wait [#allocation6], 32  }
  0x26   :  { %4702 = vsyncadd [#allocation6], 4294967264  ;;  %vm72_vm0 = vcmask 261120   ;;  %v68_v0 = vld [vmem:[#allocation2] sm:$0xff]  ;;  %v69_v1 = vld [vmem:[#allocation2 + $0x8] sm:$0xff]  ;;  %v4709_v36 = vmov 0.0   ;;  %v118_v46 = vlaneseq }
  0x27   :  { %v73_v2 = vsel %vm72_vm0, %v68_v0, 0.0  ;;  %v76_v3 = vsel %vm72_vm0, %v69_v1, 0.0  ;;  %v142_v14 = vld [vmem:[%s5441_s3] sm:$0xff]  ;;  %v143_v15 = vld [vmem:[%s5441_s3 + $0x8] sm:$0xff]  ;;  %v144_v16 = vld [vmem:[%s5441_s3 + $0x10] sm:$0xff]  ;;  %4168 = vmatprep.subr.mxu1 %v4709_v36  ;;  %vm4710_vm1 = vmmov 0  }
  0x28   :  { %74 = vadd.xlane.f32.xlu0 %v73_v2  ;;  %v4432_v17 = vpack.c.bf16 %v143_v15, %v142_v14  ;;  %v145_v18 = vld [vmem:[%s5441_s3 + $0x18] sm:$0xff]  ;;  %v3934_v27 = vld [vmem:[#allocation5] ss:$0 sm:$0xff]  ;;  %v3935_v29 = vld [vmem:[#allocation5 + $0x1] ss:$0 sm:$0xff]  ;;  %4170 = vmatprep.mubr.msk.f32.mxu1 %vm4710_vm1, %v4709_v36  ;;  %s4711_s21 = smov 96  }
  0x29   :  { %v4436_v19 = vpack.c.bf16 %v145_v18, %v144_v16  ;;  %v3937_v37 = vld [vmem:[%s5442_s4] ss:$0 sm:$0xff]  ;;  %vm237_vm2 = vcmask 64512   ;;  %v4712_v44 = vmov 1966171168   ;;  %v4871_v48 = vshrl.u32 %v118_v46, 7 }
  0x2a   :  { %4433 = vmatprep.subr.bf16.mxu0 %v4432_v17  ;;  %v116_v45 = vunpack.c.l.s4 %v4712_v44  ;;  %v112_v49 = vld [vmem:[%s5439_s1] sm:$0x3]  ;;  %s4713_s1 = smov 64   ;;  %s4714_s25 = smov 88   ;;  %vm1610_vm3 = vcmask 195584   ;;  %vm1607_vm4 = vcmask 130048  }
  0x2b   :  { %4435 = vmatpush3.bf16.msra.mxu0 %v4432_v17  ;;  %v3936_v50 = vadd.f32 -1.0, %v112_v49  ;;  %v4878_v56 = vsub.s32 0, %v4871_v48  ;;  %s4715_s26 = smov 120   ;;  %s4716_s27 = smov 56   ;;  %vm1864_vm5 = vcmask 523264  }
  0x2c   :  { %77 = vadd.xlane.f32.xlu0 %v76_v3  ;;  %4437 = vmatprep.subr.bf16.mxu0 %v4436_v19  ;;  %v117_v47 = vunpack.c.0.s8 %v116_v45  ;;  %s4717_s0 = smov 80   ;;  %s4718_s22 = smov 112  }
  0x2d   :  { %s4719_s2 = smov 48   ;;  %s4720_s28 = smov 72  }
  0x2e   :  { %v120_v51 = vsub.s32 %v117_v47, %v4871_v48  ;;  %s4721_s29 = smov 104   ;;  %s4722_s30 = smov 40  }
  0x2f   :  { %4439 = vmatpush3.bf16.msra.mxu0 %v4436_v19  ;;  %s5454_s15 = smov 16   ;;  %s5452_s16 = smov 24  }
  0x30   :  { %4188 = vmatprep.subr.mxu0 %v4709_v36  ;;  %v121_v52 = vrot.slane %v3936_v50, %v120_v51 }
  0x32   :  { %v129_v53 = vrot.slane %v121_v52, %v120_v51  ;;  %v122_v54 = vcombine.high %v121_v52, %v121_v52 }
  0x34   :  { %v139_v55 = vmul.f32 1e+09, %v129_v53  ;;  %v136_v57 = vrot.slane %v122_v54, %v120_v51 }
  0x36   :  { %v4881_v58 = vrot.slane %v139_v55, %v4878_v56  ;;  %v140_v59 = vmul.f32 1e+09, %v136_v57 }
  0xb5   :  { %v75_v4 = vpop.xlane.xlu0 %74 }
  0xb6   :  { %v80_v5 = vmul.f32 0.03125, %v75_v4 }
  0xb8   :  { %v82_v6 = vsub.f32 %v68_v0, %v80_v5  ;;  %v4885_v0 = vrot.slane %v140_v59, %v4878_v56 }
  0xb9   :  { %v78_v7 = vpop.xlane.xlu0 %77 }
  0xba   :  { %v81_v8 = vmul.f32 0.03125, %v78_v7  ;;  %v84_v9 = vmul.f32 %v82_v6, %v82_v6 }
  0xbc   :  { %v83_v10 = vsub.f32 %v69_v1, %v81_v8  ;;  %v86_v11 = vsel %vm72_vm0, %v84_v9, 0.0 }
  0xbd   :  { %87 = vadd.xlane.f32.xlu1 %v86_v11 }
  0xbe   :  { %v85_v12 = vmul.f32 %v83_v10, %v83_v10 }
  0xc0   :  { %v89_v13 = vsel %vm72_vm0, %v85_v12, 0.0 }
  0xc1   :  { %90 = vadd.xlane.f32.xlu1 %v89_v13 }
 0x14a   :  { %v88_v20 = vpop.xlane.xlu1 %87 }
 0x14b   :  { %v92_v21 = vmul.f32 0.03125, %v88_v20 }
 0x14d   :  { %v94_v22 = vadd.f32 1e-12, %v92_v21 }
 0x14e   :  { %v91_v23 = vpop.xlane.xlu1 %90 }
 0x14f   :  { %4541 = vrsqrt.f32 %v94_v22  ;;  %v93_v24 = vmul.f32 0.03125, %v91_v23 }
 0x151   :  { %v95_v25 = vadd.f32 1e-12, %v93_v24 }
 0x153   :  { %4543 = vrsqrt.f32 %v95_v25 }
 0x159   :  { %v4542_v26 = vpop.eup %4541 }
 0x15a   :  { %v98_v28 = vmul.f32 %v4542_v26, %v82_v6 }
 0x15c   :  { %v104_v30 = vmul.f32 %v3934_v27, %v98_v28 }
 0x15d   :  { %v4544_v31 = vpop.eup %4543 }
 0x15e   :  { %v99_v32 = vmul.f32 %v4544_v31, %v83_v10  ;;  %v4834_v33 = vadd.f32 %v3935_v29, %v104_v30 }
 0x160   :  { %v105_v34 = vmul.f32 %v3934_v27, %v99_v32  ;;  %4165 = vmatprep.mubr.msk.f32.mxu0 %vm72_vm0, %v4834_v33 }
 0x162   :  { %v4838_v35 = vadd.f32 %v3935_v29, %v105_v34 }
 0x164   :  { %4166 = vmatmul.mubr.msk.f32.vlgmr.msra.gmra.mrb[0].mxu0 %vm72_vm0, %v4838_v35 }
 0x165   :  { %4190 = vmatprep.mubr.msk.f32.mxu0 %vm4710_vm1, %v4709_v36 }
 0x237   :  { %v4167_v38 = vpop.f32.mrb[0].mxu0 }
 0x238   :  { %v4851_v39 = vadd.f32 %v4167_v38, %v3937_v37  ;;  %v225_v40 = vpop.f32.mrb[1].mxu0 }
 0x239   :  { %v4853_v41 = vadd.f32 %v3937_v37, %v225_v40 }
 0x23a   :  { %313 = vrot.lane.b32.xlu1 %v4851_v39, %s4711_s21 }
 0x23b   :  { %235 = vrot.lane.b32.xlu0 %v4853_v41, %s4711_s21 }
 0x2ac   :  { %v314_v43 = vpop.permute.xlu1 %313 }
 0x2ad   :  { %v236_v42 = vpop.permute.xlu0 %235 }
 0x2ae   :  { %4169 = vmatpush3.xpose.msk.msra.mxu1 %vm237_vm2, %v236_v42 }
 0x2af   :  { %4173 = vmatprep.subr.mxu1 %v4709_v36 }
 0x2b1   :  { %4171 = vmatmul.mubr.msk.f32.vlgmr.msra.gmra.mrb[0].mxu1 %vm237_vm2, %v4853_v41 }
 0x2b2   :  { %4174 = vmatpush3.xpose.msk.msra.mxu1 %vm237_vm2, %v314_v43  ;;  %4175 = vmatprep.mubr.msk.f32.mxu1 %vm4710_vm1, %v4709_v36 }
 0x2b3   :  { %4178 = vmatprep.subr.mxu1 %v4709_v36 }
 0x2b5   :  { %4176 = vmatmul.mubr.msk.f32.vlgmr.msra.gmra.mrb[2].mxu1 %vm237_vm2, %v4851_v39 }
 0x2b6   :  { %4180 = vmatprep.mubr.msk.f32.mxu1 %vm4710_vm1, %v4709_v36 }
 0x384   :  { %v308_v60 = vpop.f32.mrb[0].mxu1 }
 0x385   :  { %v389_v61 = vmul.f32 0.35355338, %v308_v60  ;;  %v4172_v62 = vpop.f32.mrb[1].mxu1 }
 0x387   :  { %v403_v63 = vadd.f32 %v4881_v58, %v389_v61 }
 0x388   :  { %v385_v1 = vpop.f32.mrb[2].mxu1 }
 0x389   :  { %v390_v2 = vmul.f32 0.35355338, %v385_v1  ;;  %v4177_v3 = vpop.f32.mrb[3].mxu1  ;;  %v405_v4 = vsel %vm237_vm2, %v403_v63, -inf }
 0x38a   :  { %406 = vmax.xlane.f32.xlu1 %v405_v4 }
 0x38b   :  { %v404_v5 = vadd.f32 %v4885_v0, %v390_v2 }
 0x38d   :  { %v408_v6 = vsel %vm237_vm2, %v404_v5, -inf }
 0x38e   :  { %409 = vmax.xlane.f32.xlu0 %v408_v6 }
 0x39b   :  { %503 = vrot.lane.b32.xlu1 %v4851_v39, %s4713_s1 }
 0x39f   :  { %581 = vrot.lane.b32.xlu1 %v4853_v41, %s4714_s25 }
 0x3a3   :  { %659 = vrot.lane.b32.xlu1 %v4851_v39, %s4714_s25 }
 0x417   :  { %v407_v7 = vpop.xlane.xlu1 %406 }
 0x418   :  { %v411_v8 = vsub.f32 %v403_v63, %v407_v7 }
 0x41a   :  { %v413_v9 = vmul.f32 1.442695, %v411_v8 }
 0x41b   :  { %v504_v10 = vpop.permute.xlu1 %503  ;;  %v410_v11 = vpop.xlane.xlu0 %409 }
 0x41c   :  { %4545 = vpow2.f32 %v413_v9  ;;  %v412_v12 = vsub.f32 %v404_v5, %v410_v11 }
 0x41e   :  { %v415_v13 = vmul.f32 1.442695, %v412_v12 }
 0x41f   :  { %v582_v14 = vpop.permute.xlu1 %581 }
 0x420   :  { %4547 = vpow2.f32 %v415_v13  ;;  %4189 = vmatpush3.xpose.msk.msra.mxu0 %vm237_vm2, %v582_v14 }
 0x421   :  { %4198 = vmatprep.subr.mxu0 %v4709_v36 }
 0x423   :  { %v660_v19 = vpop.permute.xlu1 %659 }
 0x426   :  { %v4546_v15 = vpop.eup %4545 }
 0x427   :  { %v417_v16 = vsel %vm237_vm2, %v4546_v15, 0.0 }
 0x428   :  { %418 = vadd.xlane.f32.xlu0 %v417_v16 }
 0x42a   :  { %v4548_v17 = vpop.eup %4547 }
 0x42b   :  { %v420_v18 = vsel %vm237_vm2, %v4548_v17, 0.0 }
 0x42c   :  { %421 = vadd.xlane.f32.xlu1 %v420_v18 }
 0x43d   :  { %657 = vrot.lane.b32.xlu1 %v4851_v39, %s4715_s26 }
 0x43e   :  { %427 = vrot.lane.b32.xlu0 %v4853_v41, %s4713_s1 }
 0x442   :  { %579 = vrot.lane.b32.xlu0 %v4853_v41, %s4715_s26 }
 0x4b5   :  { %v419_v20 = vpop.xlane.xlu0 %418 }
 0x4b6   :  { %4549 = vrcp.f32 %v419_v20 }
 0x4b9   :  { %v422_v21 = vpop.xlane.xlu1 %421  ;;  %v428_v22 = vpop.permute.xlu0 %427 }
 0x4ba   :  { %4551 = vrcp.f32 %v422_v21  ;;  %4179 = vmatpush3.msra.mxu1 %v428_v22 }
 0x4bb   :  { %4183 = vmatprep.subr.mxu1 %v4709_v36 }
 0x4bd   :  { %v580_v23 = vpop.permute.xlu0 %579  ;;  %v658_v28 = vpop.permute.xlu1 %657 }
 0x4be   :  { %4191 = vmatmul.mubr.msk.f32.vlgmr.msra.gmra.mrb[2].mxu0 %vm237_vm2, %v580_v23 }
 0x4bf   :  { %4200 = vmatprep.mubr.msk.f32.mxu0 %vm4710_vm1, %v4709_v36 }
 0x4c0   :  { %v4550_v24 = vpop.eup %4549 }
 0x4c1   :  { %v425_v25 = vmul.f32 %v4550_v24, %v4546_v15 }
 0x4c3   :  { %4181 = vmatmul.mubr.msk.f32.vlgmr.msra.gmra.mrb[4].mxu1 %vm237_vm2, %v425_v25 }
 0x4c4   :  { %v4552_v26 = vpop.eup %4551  ;;  %4184 = vmatpush3.msra.mxu1 %v504_v10  ;;  %4185 = vmatprep.mubr.msk.f32.mxu1 %vm4710_vm1, %v4709_v36 }
 0x4c5   :  { %v426_v27 = vmul.f32 %v4552_v26, %v4548_v17  ;;  %4193 = vmatprep.subr.mxu1 %v4709_v36 }
 0x4c7   :  { %4186 = vmatmul.mubr.msk.f32.vlgmr.msra.gmra.mrb[6].mxu1 %vm237_vm2, %v426_v27 }
 0x4c8   :  { %4195 = vmatprep.mubr.msk.f32.mxu1 %vm4710_vm1, %v4709_v36 }
 0x4cb   :  { %4194 = vmatpush3.xpose.msk.msra.mxu1 %vm237_vm2, %v660_v19 }
 0x4cc   :  { %4203 = vmatprep.subr.mxu1 %v4709_v36 }
 0x4ce   :  { %4196 = vmatmul.mubr.msk.f32.vlgmr.msra.gmra.mrb[8].mxu1 %vm237_vm2, %v658_v28 }
 0x4cf   :  { %4205 = vmatprep.mubr.msk.f32.mxu1 %vm4710_vm1, %v4709_v36 }
 0x591   :  { %v653_v29 = vpop.f32.mrb[2].mxu0 }
 0x592   :  { %v735_v30 = vmul.f32 0.35355338, %v653_v29  ;;  %v4192_v31 = vpop.f32.mrb[3].mxu0 }
 0x594   :  { %v737_v32 = vadd.f32 %v735_v30, %v4881_v58 }
 0x596   :  { %v4923_v34 = vpop.f32.mrb[4].mxu1  ;;  %v739_v37 = vsel %vm237_vm2, %v737_v32, -inf }
 0x597   :  { %740 = vmax.xlane.f32.xlu0 %v739_v37  ;;  %v4182_v38 = vpop.f32.mrb[5].mxu1 }
 0x59a   :  { %v4926_v40 = vpop.f32.mrb[6].mxu1 }
 0x59b   :  { %v4187_v42 = vpop.f32.mrb[7].mxu1 }
 0x5a1   :  { %v731_v43 = vpop.f32.mrb[8].mxu1 }
 0x5a2   :  { %v736_v44 = vmul.f32 0.35355338, %v731_v43  ;;  %v4197_v45 = vpop.f32.mrb[9].mxu1 }
 0x5a4   :  { %v738_v46 = vadd.f32 %v736_v44, %v4885_v0 }
 0x5a6   :  { %v742_v47 = vsel %vm237_vm2, %v738_v46, -inf }
 0x5a7   :  { %743 = vmax.xlane.f32.xlu1 %v742_v47 }
 0x5b8   :  { %837 = vrot.lane.b32.xlu1 %v4851_v39, %s4716_s27 }
 0x5bc   :  { %915 = vrot.lane.b32.xlu1 %v4853_v41, %s4717_s0 }
 0x5c0   :  { %993 = vrot.lane.b32.xlu1 %v4851_v39, %s4717_s0 }
 0x5c4   :  { %991 = vrot.lane.b32.xlu1 %v4851_v39, %s4718_s22 }
 0x624   :  { %v741_v49 = vpop.xlane.xlu0 %740 }
 0x625   :  { %v745_v50 = vsub.f32 %v737_v32, %v741_v49 }
 0x627   :  { %v747_v51 = vmul.f32 1.442695, %v745_v50 }
 0x629   :  { %4553 = vpow2.f32 %v747_v51 }
 0x633   :  { %v4554_v52 = vpop.eup %4553 }
 0x634   :  { %v744_v53 = vpop.xlane.xlu1 %743  ;;  %v751_v54 = vsel %vm237_vm2, %v4554_v52, 0.0 }
 0x635   :  { %752 = vadd.xlane.f32.xlu0 %v751_v54  ;;  %v746_v57 = vsub.f32 %v738_v46, %v744_v53 }
 0x637   :  { %v749_v59 = vmul.f32 1.442695, %v746_v57 }
 0x638   :  { %v838_v55 = vpop.permute.xlu1 %837 }
 0x639   :  { %4204 = vmatpush3.msra.mxu1 %v838_v55  ;;  %4555 = vpow2.f32 %v749_v59 }
 0x63a   :  { %4213 = vmatprep.subr.mxu1 %v4709_v36 }
 0x63c   :  { %v916_v3 = vpop.permute.xlu1 %915 }
 0x640   :  { %v994_v7 = vpop.permute.xlu1 %993 }
 0x643   :  { %v4556_v60 = vpop.eup %4555 }
 0x644   :  { %v754_v61 = vsel %vm237_vm2, %v4556_v60, 0.0  ;;  %v992_v9 = vpop.permute.xlu1 %991 }
 0x64b   :  { %761 = vrot.lane.b32.xlu0 %v4853_v41, %s4716_s27 }
 0x66a   :  { %755 = vadd.xlane.f32.xlu0 %v754_v61 }
 0x680   :  { %913 = vrot.lane.b32.xlu0 %v4853_v41, %s4718_s22 }
 0x6c2   :  { %v753_v62 = vpop.xlane.xlu0 %752 }
 0x6c3   :  { %4557 = vrcp.f32 %v753_v62 }
 0x6c6   :  { %v762_v63 = vpop.permute.xlu0 %761 }
 0x6c7   :  { %4199 = vmatpush3.msra.mxu0 %v762_v63 }
 0x6c8   :  { %4208 = vmatprep.subr.mxu0 %v4709_v36 }
 0x6cd   :  { %v4558_v1 = vpop.eup %4557 }
 0x6ce   :  { %v759_v2 = vmul.f32 %v4558_v1, %v4554_v52 }
 0x6d0   :  { %4201 = vmatmul.mubr.msk.f32.vlgmr.msra.gmra.mrb[4].mxu0 %vm237_vm2, %v759_v2 }
 0x6d1   :  { %4209 = vmatpush3.xpose.msk.msra.mxu0 %vm237_vm2, %v916_v3  ;;  %4210 = vmatprep.mubr.msk.f32.mxu0 %vm4710_vm1, %v4709_v36 }
 0x6d2   :  { %4218 = vmatprep.subr.mxu0 %v4709_v36 }
 0x6f7   :  { %v756_v4 = vpop.xlane.xlu0 %755 }
 0x6f8   :  { %4559 = vrcp.f32 %v756_v4 }
 0x6fb   :  { %v914_v5 = vpop.permute.xlu0 %913 }
 0x6fc   :  { %4211 = vmatmul.mubr.msk.f32.vlgmr.msra.gmra.mrb[6].mxu0 %vm237_vm2, %v914_v5 }
 0x6fd   :  { %4220 = vmatprep.mubr.msk.f32.mxu0 %vm4710_vm1, %v4709_v36 }
 0x702   :  { %v4560_v6 = vpop.eup %4559 }
 0x703   :  { %v760_v8 = vmul.f32 %v4560_v6, %v4556_v60 }
 0x705   :  { %4206 = vmatmul.mubr.msk.f32.vlgmr.msra.gmra.mrb[10].mxu1 %vm237_vm2, %v760_v8 }
 0x706   :  { %4214 = vmatpush3.xpose.msk.msra.mxu1 %vm237_vm2, %v994_v7  ;;  %4215 = vmatprep.mubr.msk.f32.mxu1 %vm4710_vm1, %v4709_v36 }
 0x707   :  { %4223 = vmatprep.subr.mxu1 %v4709_v36 }
 0x709   :  { %4216 = vmatmul.mubr.msk.f32.vlgmr.msra.gmra.mrb[12].mxu1 %vm237_vm2, %v992_v9 }
 0x70a   :  { %4225 = vmatprep.mubr.msk.f32.mxu1 %vm4710_vm1, %v4709_v36 }
 0x7a3   :  { %v4962_v10 = vpop.f32.mrb[4].mxu0 }
 0x7a4   :  { %v4202_v11 = vpop.f32.mrb[5].mxu0 }
 0x7cf   :  { %v987_v12 = vpop.f32.mrb[6].mxu0 }
 0x7d0   :  { %v1069_v13 = vmul.f32 0.35355338, %v987_v12  ;;  %v4212_v14 = vpop.f32.mrb[7].mxu0 }
 0x7d2   :  { %v1071_v15 = vadd.f32 %v1069_v13, %v4881_v58 }
 0x7d4   :  { %v1073_v16 = vsel %vm237_vm2, %v1071_v15, -inf }
 0x7d5   :  { %1074 = vmax.xlane.f32.xlu0 %v1073_v16 }
 0x7d8   :  { %v4966_v17 = vpop.f32.mrb[10].mxu1 }
 0x7d9   :  { %v4207_v18 = vpop.f32.mrb[11].mxu1 }
 0x7dc   :  { %v1065_v19 = vpop.f32.mrb[12].mxu1 }
 0x7dd   :  { %v1070_v20 = vmul.f32 0.35355338, %v1065_v19  ;;  %v4217_v21 = vpop.f32.mrb[13].mxu1 }
 0x7df   :  { %v1072_v22 = vadd.f32 %v1070_v20, %v4885_v0 }
 0x7e1   :  { %v1076_v23 = vsel %vm237_vm2, %v1072_v22, -inf }
 0x7e2   :  { %1077 = vmax.xlane.f32.xlu1 %v1076_v23 }
 0x7f3   :  { %1171 = vrot.lane.b32.xlu1 %v4851_v39, %s4719_s2 }
 0x7f7   :  { %1249 = vrot.lane.b32.xlu1 %v4853_v41, %s4720_s28 }
 0x7fb   :  { %1327 = vrot.lane.b32.xlu1 %v4851_v39, %s4720_s28 }
 0x7ff   :  { %1325 = vrot.lane.b32.xlu1 %v4851_v39, %s4721_s29 }
 0x862   :  { %v1075_v24 = vpop.xlane.xlu0 %1074 }
 0x863   :  { %v1079_v25 = vsub.f32 %v1071_v15, %v1075_v24  ;;  %v1614_v24 = vld [vmem:[%s5443_s5 + $0x8] sm:$0xff] }
 0x865   :  { %v1081_v26 = vmul.f32 1.442695, %v1079_v25 }
 0x867   :  { %4561 = vpow2.f32 %v1081_v26  ;;  %v1615_v26 = vld [vmem:[%s5443_s5 + $0x10] sm:$0xff] }
 0x86f   :  { %v1078_v27 = vpop.xlane.xlu1 %1077 }
 0x870   :  { %v1080_v31 = vsub.f32 %v1072_v22, %v1078_v27  ;;  %v1616_v27 = vld [vmem:[%s5443_s5 + $0x18] sm:$0xff] }
 0x871   :  { %v4562_v28 = vpop.eup %4561 }
 0x872   :  { %v1085_v29 = vsel %vm237_vm2, %v4562_v28, 0.0  ;;  %v1083_v32 = vmul.f32 1.442695, %v1080_v31 }
 0x873   :  { %1086 = vadd.xlane.f32.xlu0 %v1085_v29  ;;  %v1172_v30 = vpop.permute.xlu1 %1171 }
 0x874   :  { %4224 = vmatpush3.msra.mxu1 %v1172_v30  ;;  %4563 = vpow2.f32 %v1083_v32 }
 0x875   :  { %4233 = vmatprep.subr.mxu1 %v4709_v36 }
 0x877   :  { %v1250_v46 = vpop.permute.xlu1 %1249 }
 0x87b   :  { %v1328_v51 = vpop.permute.xlu1 %1327 }
 0x87e   :  { %v4564_v37 = vpop.eup %4563 }
 0x87f   :  { %v1088_v38 = vsel %vm237_vm2, %v4564_v37, 0.0  ;;  %v1326_v53 = vpop.permute.xlu1 %1325 }
 0x889   :  { %1095 = vrot.lane.b32.xlu0 %v4853_v41, %s4719_s2 }
 0x8a8   :  { %1089 = vadd.xlane.f32.xlu0 %v1088_v38 }
 0x8be   :  { %1247 = vrot.lane.b32.xlu0 %v4853_v41, %s4721_s29 }
 0x900   :  { %v1087_v42 = vpop.xlane.xlu0 %1086 }
 0x901   :  { %4565 = vrcp.f32 %v1087_v42 }
 0x904   :  { %v1096_v43 = vpop.permute.xlu0 %1095 }
 0x905   :  { %4219 = vmatpush3.msra.mxu0 %v1096_v43 }
 0x906   :  { %4228 = vmatprep.subr.mxu0 %v4709_v36 }
 0x90b   :  { %v4566_v44 = vpop.eup %4565 }
 0x90c   :  { %v1093_v45 = vmul.f32 %v4566_v44, %v4562_v28  ;;  %v4444_v28 = vpack.c.bf16 %v1616_v27, %v1615_v26 }
 0x90e   :  { %4221 = vmatmul.mubr.msk.f32.vlgmr.msra.gmra.mrb[8].mxu0 %vm237_vm2, %v1093_v45 }
 0x90f   :  { %4229 = vmatpush3.xpose.msk.msra.mxu0 %vm237_vm2, %v1250_v46  ;;  %4230 = vmatprep.mubr.msk.f32.mxu0 %vm4710_vm1, %v4709_v36 }
 0x910   :  { %4238 = vmatprep.subr.mxu0 %v4709_v36 }
 0x935   :  { %v1090_v47 = vpop.xlane.xlu0 %1089 }
 0x936   :  { %4567 = vrcp.f32 %v1090_v47 }
 0x939   :  { %v1248_v49 = vpop.permute.xlu0 %1247 }
 0x93a   :  { %4231 = vmatmul.mubr.msk.f32.vlgmr.msra.gmra.mrb[10].mxu0 %vm237_vm2, %v1248_v49 }
 0x93b   :  { %4240 = vmatprep.mubr.msk.f32.mxu0 %vm4710_vm1, %v4709_v36 }
 0x940   :  { %v4568_v50 = vpop.eup %4567 }
 0x941   :  { %v1094_v52 = vmul.f32 %v4568_v50, %v4564_v37 }
 0x943   :  { %4226 = vmatmul.mubr.msk.f32.vlgmr.msra.gmra.mrb[14].mxu1 %vm237_vm2, %v1094_v52 }
 0x944   :  { %4234 = vmatpush3.xpose.msk.msra.mxu1 %vm237_vm2, %v1328_v51  ;;  %4235 = vmatprep.mubr.msk.f32.mxu1 %vm4710_vm1, %v4709_v36 }
 0x945   :  { %4243 = vmatprep.subr.mxu1 %v4709_v36 }
 0x947   :  { %4236 = vmatmul.mubr.msk.f32.vlgmr.msra.gmra.mrb[16].mxu1 %vm237_vm2, %v1326_v53 }
 0x948   :  { %4245 = vmatprep.mubr.msk.f32.mxu1 %vm4710_vm1, %v4709_v36 }
 0x9e1   :  { %v1167_v54 = vpop.f32.mrb[8].mxu0 }
 0x9e2   :  { %v4222_v55 = vpop.f32.mrb[9].mxu0 }
 0xa0d   :  { %v1321_v57 = vpop.f32.mrb[10].mxu0 }
 0xa0e   :  { %v1403_v59 = vmul.f32 0.35355338, %v1321_v57  ;;  %v4232_v60 = vpop.f32.mrb[11].mxu0 }
 0xa10   :  { %v1405_v61 = vadd.f32 %v1403_v59, %v4881_v58 }
 0xa12   :  { %v1407_v62 = vsel %vm237_vm2, %v1405_v61, -inf }
 0xa13   :  { %1408 = vmax.xlane.f32.xlu0 %v1407_v62 }
 0xa16   :  { %v1243_v63 = vpop.f32.mrb[14].mxu1 }
 0xa17   :  { %v4227_v1 = vpop.f32.mrb[15].mxu1 }
 0xa1a   :  { %v1399_v2 = vpop.f32.mrb[16].mxu1 }
 0xa1b   :  { %v1404_v3 = vmul.f32 0.35355338, %v1399_v2  ;;  %v4237_v4 = vpop.f32.mrb[17].mxu1 }
 0xa1d   :  { %v1406_v5 = vadd.f32 %v1404_v3, %v4885_v0 }
 0xa1f   :  { %v1410_v6 = vsel %vm237_vm2, %v1406_v5, -inf }
 0xa20   :  { %1411 = vmax.xlane.f32.xlu1 %v1410_v6 }
 0xa31   :  { %1505 = vrot.lane.b32.xlu1 %v4851_v39, %s4722_s30 }
 0xa35   :  { %1583 = vrot.lane.b32.xlu1 %v4962_v10, %s5456_s14 }
 0xa39   :  { %1585 = vrot.lane.b32.xlu1 %v4966_v17, %s5456_s14 }
 0xa3d   :  { %1593 = vrot.lane.b32.xlu1 %v1243_v63, %s5454_s15 }
 0xaa0   :  { %v1409_v7 = vpop.xlane.xlu0 %1408 }
 0xaa1   :  { %v1413_v8 = vsub.f32 %v1405_v61, %v1409_v7 }
 0xaa3   :  { %v1415_v9 = vmul.f32 1.442695, %v1413_v8 }
 0xaa5   :  { %4569 = vpow2.f32 %v1415_v9  ;;  %v1743_v9 = vld [vmem:[%s5444_s6 + $0x8] sm:$0xff] }
 0xaad   :  { %v1412_v11 = vpop.xlane.xlu1 %1411 }
 0xaae   :  { %v1414_v12 = vsub.f32 %v1406_v5, %v1412_v11 }
 0xaaf   :  { %v4570_v13 = vpop.eup %4569 }
 0xab0   :  { %v1417_v14 = vmul.f32 1.442695, %v1414_v12  ;;  %v1419_v15 = vsel %vm237_vm2, %v4570_v13, 0.0  ;;  %v1744_v12 = vld [vmem:[%s5444_s6 + $0x10] sm:$0xff] }
 0xab1   :  { %1420 = vadd.xlane.f32.xlu0 %v1419_v15  ;;  %v1506_v39 = vpop.permute.xlu1 %1505 }
 0xab2   :  { %4571 = vpow2.f32 %v1417_v14  ;;  %4244 = vmatpush3.msra.mxu1 %v1506_v39 }
 0xab5   :  { %v1584_v37 = vpop.permute.xlu1 %1583 }
 0xab6   :  { %v1605_v43 = vsel %vm237_vm2, %v4923_v34, %v1584_v37  ;;  %v5047_v34 = vld [vmem:[%s5446_s8] sm:$0x3f]  ;;  %v1854_v37 = vld [vmem:[%s5445_s7 + $0x10] sm:$0xff] }
 0xab7   :  { %v1620_v53 = vrot.slane %v5047_v34, %v4878_v56 }
 0xab9   :  { %v1586_v42 = vpop.permute.xlu1 %1585 }
 0xaba   :  { %v1606_v49 = vsel %vm237_vm2, %v4926_v40, %v1586_v42 }
 0xabc   :  { %v4572_v10 = vpop.eup %4571 }
 0xabd   :  { %v1422_v16 = vsel %vm237_vm2, %v4572_v10, 0.0  ;;  %v1594_v47 = vpop.permute.xlu1 %1593 }
 0xabe   :  { %1423 = vadd.xlane.f32.xlu0 %v1422_v16  ;;  %v1609_v50 = vsel %vm1607_vm4, %v1606_v49, %v1594_v47  ;;  %v1859_v47 = vld [vmem:[%s5445_s7 + $0x38] sm:$0xff] }
 0xad4   :  { %1429 = vrot.lane.b32.xlu0 %v4853_v41, %s4722_s30  ;;  %v1613_v41 = vld [vmem:[%s5443_s5] sm:$0xff] }
 0xad5   :  { %v4440_v25 = vpack.c.bf16 %v1614_v24, %v1613_v41 }
 0xad8   :  { %1591 = vrot.lane.b32.xlu0 %v1167_v54, %s5454_s15 }
 0xb3e   :  { %v1421_v17 = vpop.xlane.xlu0 %1420 }
 0xb3f   :  { %4573 = vrcp.f32 %v1421_v17 }
 0xb49   :  { %v4574_v19 = vpop.eup %4573 }
 0xb4a   :  { %v1427_v20 = vmul.f32 %v4574_v19, %v4570_v13  ;;  %v1745_v13 = vld [vmem:[%s5444_s6 + $0x18] sm:$0xff]  ;;  %v1732_v19 = vsub.s32 1, %v4871_v48 }
 0xb4b   :  { %v1424_v18 = vpop.xlane.xlu0 %1423  ;;  %v4452_v14 = vpack.c.bf16 %v1745_v13, %v1744_v12 }
 0xb4c   :  { %4575 = vrcp.f32 %v1424_v18 }
 0xb4f   :  { %v1430_v21 = vpop.permute.xlu0 %1429 }
 0xb50   :  { %4239 = vmatpush3.msra.mxu0 %v1430_v21  ;;  %v1733_v21 = vrot.slane %v5047_v34, %v1732_v19 }
 0xb51   :  { %4241 = vmatmul.mubr.msk.f32.vlgmr.msra.gmra.mrb[12].mxu0 %vm237_vm2, %v1427_v20  ;;  %4441 = vmatprep.subr.bf16.mxu0 %v4440_v25  ;;  %v1738_v20 = vsub.s32 2, %v4871_v48 }
 0xb52   :  { %4443 = vmatpush3.bf16.msra.mxu0 %v4440_v25 }
 0xb53   :  { %4445 = vmatprep.subr.bf16.mxu0 %v4444_v28  ;;  %v1592_v38 = vpop.permute.xlu0 %1591  ;;  %v1739_v41 = vrot.slane %v5047_v34, %v1738_v20 }
 0xb54   :  { %v1608_v44 = vsel %vm1607_vm4, %v1605_v43, %v1592_v38  ;;  %v1855_v38 = vld [vmem:[%s5445_s7 + $0x18] sm:$0xff]  ;;  %v1856_v43 = vld [vmem:[%s5445_s7 + $0x20] sm:$0xff] }
 0xb55   :  { %v4460_v42 = vpack.c.bf16 %v1855_v38, %v1854_v37  ;;  %v3975_v37 = vld [vmem:[%s5441_s3 + $0x38] sm:$0xff] }
 0xb56   :  { %v4576_v22 = vpop.eup %4575  ;;  %4447 = vmatpush3.bf16.msra.mxu0 %v4444_v28 }
 0xb57   :  { %v1428_v23 = vmul.f32 %v4576_v22, %v4572_v10 }
 0xb59   :  { %4246 = vmatmul.mubr.msk.f32.vlgmr.msra.gmra.mrb[18].mxu1 %vm237_vm2, %v1428_v23 }
 0xc24   :  { %v1501_v29 = vpop.f32.mrb[12].mxu0 }
 0xc25   :  { %1599 = vrot.lane.b32.xlu0 %v1501_v29, %s5452_s16  ;;  %v4242_v30 = vpop.f32.mrb[13].mxu0 }
 0xc26   :  { %v1852_v30 = vld [vmem:[%s5445_s7] sm:$0xff] }
 0xc2c   :  { %v1577_v31 = vpop.f32.mrb[18].mxu1 }
 0xc2d   :  { %1601 = vrot.lane.b32.xlu1 %v1577_v31, %s5452_s16  ;;  %v4247_v32 = vpop.f32.mrb[19].mxu1  ;;  %v1853_v31 = vld [vmem:[%s5445_s7 + $0x8] sm:$0xff] }
 0xc2e   :  { %v4456_v32 = vpack.c.bf16 %v1853_v31, %v1852_v30  ;;  %v3973_v30 = vld [vmem:[%s5441_s3 + $0x28] sm:$0xff] }
 0xc30   :  { %4457 = vmatprep.subr.bf16.mxu0 %v4456_v32 }
 0xc97   :  { %v1600_v45 = vpop.permute.xlu0 %1599 }
 0xc98   :  { %v1611_v46 = vsel %vm1610_vm3, %v1608_v44, %v1600_v45  ;;  %v1857_v44 = vld [vmem:[%s5445_s7 + $0x28] sm:$0xff] }
 0xc99   :  { %4256 = vmatprep.mubr.msk.f32.mxu0 %vm72_vm0, %v1611_v46  ;;  %v4464_v45 = vpack.c.bf16 %v1857_v44, %v1856_v43  ;;  %v1858_v46 = vld [vmem:[%s5445_s7 + $0x30] sm:$0xff] }
 0xc9a   :  { %v4468_v49 = vpack.c.bf16 %v1859_v47, %v1858_v46 }
 0xc9f   :  { %v1602_v51 = vpop.permute.xlu1 %1601 }
 0xca0   :  { %v1612_v52 = vsel %vm1610_vm3, %v1609_v50, %v1602_v51  ;;  %v3966_v50 = vld [vmem:[%s5447_s9] ss:$0 sm:$0xff] }
 0xca1   :  { %4257 = vmatmul.mubr.msk.f32.vlgmr.msra.gmra.mrb[14].mxu0 %vm72_vm0, %v1612_v52 }
 0xca2   :  { %4459 = vmatpush3.bf16.msra.mxu0 %v4456_v32  ;;  %v3974_v32 = vld [vmem:[%s5441_s3 + $0x30] sm:$0xff] }
 0xca3   :  { %4461 = vmatprep.subr.bf16.mxu0 %v4460_v42  ;;  %v4476_v38 = vpack.c.bf16 %v3975_v37, %v3974_v32 }
 0xca6   :  { %4463 = vmatpush3.bf16.msra.mxu0 %v4460_v42 }
 0xca7   :  { %4465 = vmatprep.subr.bf16.mxu0 %v4464_v45 }
 0xcaa   :  { %4467 = vmatpush3.bf16.msra.mxu0 %v4464_v45 }
 0xcab   :  { %4469 = vmatprep.subr.bf16.mxu0 %v4468_v49 }
 0xcae   :  { %4471 = vmatpush3.bf16.msra.mxu0 %v4468_v49  ;;  %v1976_v49 = vsub.s32 4, %v4871_v48 }
 0xcaf   :  { %4310 = vmatprep.subr.mxu0 %v4709_v36 }
 0xd74   :  { %v4258_v54 = vpop.f32.mrb[14].mxu0 }
 0xd75   :  { %v1699_v55 = vadd.f32 %v4258_v54, %v1620_v53  ;;  %v1693_v57 = vpop.f32.mrb[15].mxu0 }
 0xd76   :  { %v1694_v59 = vadd.f32 %v1693_v57, %v1620_v53 }
 0xd77   :  { %v1703_v40 = vadd.f32 %v1699_v55, %v4838_v35 }
 0xd78   :  { %v1702_v60 = vadd.f32 %v1694_v59, %v4834_v33  ;;  %v1742_v33 = vld [vmem:[%s5444_s6] sm:$0xff] }
 0xd79   :  { %v1707_v61 = vsel %vm72_vm0, %v1703_v40, 0.0  ;;  %v4448_v11 = vpack.c.bf16 %v1743_v9, %v1742_v33  ;;  %v1862_v9 = vsub.s32 3, %v4871_v48 }
 0xd7a   :  { %1708 = vadd.xlane.f32.xlu1 %v1707_v61  ;;  %v1704_v62 = vsel %vm72_vm0, %v1702_v60, 0.0 }
 0xd7b   :  { %1705 = vadd.xlane.f32.xlu0 %v1704_v62  ;;  %4449 = vmatprep.subr.bf16.mxu1 %v4448_v11 }
 0xd7c   :  { %4451 = vmatpush3.bf16.msra.mxu1 %v4448_v11  ;;  %v1863_v11 = vrot.slane %v5047_v34, %v1862_v9 }
 0xd7d   :  { %4453 = vmatprep.subr.bf16.mxu1 %v4452_v14 }
 0xd80   :  { %4455 = vmatpush3.bf16.msra.mxu1 %v4452_v14 }
 0xe07   :  { %v1709_v63 = vpop.xlane.xlu1 %1708 }
 0xe08   :  { %v1711_v1 = vmul.f32 0.03125, %v1709_v63  ;;  %v1706_v2 = vpop.xlane.xlu0 %1705 }
 0xe09   :  { %v1710_v3 = vmul.f32 0.03125, %v1706_v2 }
 0xe0a   :  { %v1713_v4 = vsub.f32 %v1703_v40, %v1711_v1 }
 0xe0b   :  { %v1712_v5 = vsub.f32 %v1702_v60, %v1710_v3 }
 0xe0c   :  { %v1715_v8 = vmul.f32 %v1713_v4, %v1713_v4 }
 0xe0d   :  { %v1714_v6 = vmul.f32 %v1712_v5, %v1712_v5 }
 0xe0e   :  { %v1719_v35 = vsel %vm72_vm0, %v1715_v8, 0.0 }
 0xe0f   :  { %v1716_v7 = vsel %vm72_vm0, %v1714_v6, 0.0 }
 0xe10   :  { %1717 = vadd.xlane.f32.xlu0 %v1716_v7 }
 0xe14   :  { %1720 = vadd.xlane.f32.xlu0 %v1719_v35 }
 0xe9d   :  { %v1718_v15 = vpop.xlane.xlu0 %1717 }
 0xe9e   :  { %v1722_v39 = vmul.f32 0.03125, %v1718_v15 }
 0xea0   :  { %v1724_v10 = vadd.f32 1e-12, %v1722_v39 }
 0xea1   :  { %v1721_v16 = vpop.xlane.xlu0 %1720 }
 0xea2   :  { %4577 = vrsqrt.f32 %v1724_v10  ;;  %v1723_v17 = vmul.f32 0.03125, %v1721_v16 }
 0xea4   :  { %v1725_v18 = vadd.f32 1e-12, %v1723_v17 }
 0xea6   :  { %4579 = vrsqrt.f32 %v1725_v18 }
 0xeac   :  { %v4578_v22 = vpop.eup %4577 }
 0xead   :  { %v1728_v23 = vmul.f32 %v4578_v22, %v1712_v5 }
 0xeaf   :  { %v1734_v24 = vmul.f32 %v1733_v21, %v1728_v23 }
 0xeb0   :  { %v4580_v25 = vpop.eup %4579 }
 0xeb1   :  { %v1729_v26 = vmul.f32 %v4580_v25, %v1713_v4  ;;  %v1740_v27 = vadd.f32 %v1739_v41, %v1734_v24 }
 0xeb3   :  { %v1735_v28 = vmul.f32 %v1733_v21, %v1729_v26  ;;  %4267 = vmatprep.mubr.msk.f32.mxu1 %vm72_vm0, %v1740_v27 }
 0xeb5   :  { %v1741_v29 = vadd.f32 %v1739_v41, %v1735_v28 }
 0xeb7   :  { %4268 = vmatmul.mubr.msk.f32.vlgmr.msra.gmra.mrb[20].mxu1 %vm72_vm0, %v1741_v29 }
 0xf8a   :  { %v4269_v51 = vpop.f32.mrb[20].mxu1 }
 0xf8b   :  { %v1831_v52 = vadd.f32 %v4269_v51, %v3966_v50  ;;  %v1825_v53 = vpop.f32.mrb[21].mxu1  ;;  %v1977_v51 = vrot.slane %v5047_v34, %v1976_v49 }
 0xf8c   :  { %v1826_v54 = vadd.f32 %v3966_v50, %v1825_v53  ;;  %v1982_v50 = vsub.s32 5, %v4871_v48 }
 0xf8d   :  { %v1837_v55 = vmul.f32 0.044715, %v1831_v52  ;;  %v1835_v8 = vmul.f32 0.5, %v1831_v52 }
 0xf8e   :  { %v1836_v57 = vmul.f32 0.044715, %v1826_v54  ;;  %v1834_v6 = vmul.f32 0.5, %v1826_v54 }
 0xf8f   :  { %v1839_v59 = vmul.f32 %v1837_v55, %v1831_v52 }
 0xf90   :  { %v1838_v40 = vmul.f32 %v1836_v57, %v1826_v54  ;;  %v1983_v57 = vrot.slane %v5047_v34, %v1982_v50 }
 0xf91   :  { %v1841_v60 = vmul.f32 %v1839_v59, %v1831_v52 }
 0xf92   :  { %v1840_v61 = vmul.f32 %v1838_v40, %v1826_v54 }
 0xf93   :  { %v1843_v62 = vadd.f32 %v1841_v60, %v1831_v52 }
 0xf94   :  { %v1842_v63 = vadd.f32 %v1840_v61, %v1826_v54 }
 0xf95   :  { %v1845_v1 = vmul.f32 0.7978846, %v1843_v62  ;;  %v3977_v62 = vld [vmem:[%s5442_s4 + $0x1] ss:$0 sm:$0xff]  ;;  %s5458_s4 = smov 8  }
 0xf96   :  { %v1844_v2 = vmul.f32 0.7978846, %v1842_v63 }
 0xf97   :  { %4581 = vtanh.f32 %v1845_v1 }
 0xf98   :  { %4583 = vtanh.f32 %v1844_v2 }
 0xfa1   :  { %v4582_v3 = vpop.eup %4581 }
 0xfa2   :  { %v4584_v4 = vpop.eup %4583  ;;  %v1849_v5 = vadd.f32 1.0, %v4582_v3 }
 0xfa3   :  { %v1848_v7 = vadd.f32 1.0, %v4584_v4 }
 0xfa4   :  { %v1851_v33 = vmul.f32 %v1849_v5, %v1835_v8 }
 0xfa5   :  { %v1850_v35 = vmul.f32 %v1848_v7, %v1834_v6 }
 0xfa7   :  { %4286 = vmatprep.mubr.msk.f32.mxu0 %vm1864_vm5, %v1850_v35 }
 0xfa8   :  { %4287 = vmatmul.mubr.msk.f32.vlgmr.msra.gmra.mrb[16].mxu0 %vm1864_vm5, %v1851_v33 }
 0xfa9   :  { %4312 = vmatprep.mubr.msk.f32.mxu0 %vm4710_vm1, %v4709_v36 }
0x107b   :  { %v4288_v12 = vpop.f32.mrb[16].mxu0 }
0x107c   :  { %v1943_v13 = vadd.f32 %v4288_v12, %v1863_v11  ;;  %v1937_v14 = vpop.f32.mrb[17].mxu0 }
0x107d   :  { %v1938_v15 = vadd.f32 %v1937_v14, %v1863_v11 }
0x107e   :  { %v1947_v39 = vadd.f32 %v1943_v13, %v1741_v29 }
0x107f   :  { %v1946_v10 = vadd.f32 %v1938_v15, %v1740_v27  ;;  %v3972_v27 = vld [vmem:[%s5441_s3 + $0x20] sm:$0xff] }
0x1080   :  { %v1951_v16 = vsel %vm72_vm0, %v1947_v39, 0.0  ;;  %v4472_v31 = vpack.c.bf16 %v3973_v30, %v3972_v27 }
0x1081   :  { %1952 = vadd.xlane.f32.xlu1 %v1951_v16  ;;  %v1948_v17 = vsel %vm72_vm0, %v1946_v10, 0.0 }
0x1082   :  { %1949 = vadd.xlane.f32.xlu0 %v1948_v17  ;;  %4473 = vmatprep.subr.bf16.mxu1 %v4472_v31 }
0x1083   :  { %4475 = vmatpush3.bf16.msra.mxu1 %v4472_v31 }
0x1084   :  { %4477 = vmatprep.subr.bf16.mxu1 %v4476_v38 }
0x1087   :  { %4479 = vmatpush3.bf16.msra.mxu1 %v4476_v38 }
0x1088   :  { %4300 = vmatprep.subr.mxu1 %v4709_v36 }
0x110e   :  { %v1953_v18 = vpop.xlane.xlu1 %1952 }
0x110f   :  { %v1955_v21 = vmul.f32 0.03125, %v1953_v18  ;;  %v1950_v22 = vpop.xlane.xlu0 %1949 }
0x1110   :  { %v1954_v23 = vmul.f32 0.03125, %v1950_v22 }
0x1111   :  { %v1957_v41 = vsub.f32 %v1947_v39, %v1955_v21 }
0x1112   :  { %v1956_v24 = vsub.f32 %v1946_v10, %v1954_v23 }
0x1113   :  { %v1959_v25 = vmul.f32 %v1957_v41, %v1957_v41 }
0x1114   :  { %v1958_v26 = vmul.f32 %v1956_v24, %v1956_v24 }
0x1115   :  { %v1963_v28 = vsel %vm72_vm0, %v1959_v25, 0.0 }
0x1116   :  { %1964 = vadd.xlane.f32.xlu1 %v1963_v28  ;;  %v1960_v29 = vsel %vm72_vm0, %v1958_v26, 0.0 }
0x1117   :  { %1961 = vadd.xlane.f32.xlu0 %v1960_v29 }
0x11a3   :  { %v1965_v42 = vpop.xlane.xlu1 %1964 }
0x11a4   :  { %v1967_v43 = vmul.f32 0.03125, %v1965_v42  ;;  %v1962_v44 = vpop.xlane.xlu0 %1961 }
0x11a5   :  { %v1966_v45 = vmul.f32 0.03125, %v1962_v44 }
0x11a6   :  { %v1969_v46 = vadd.f32 1e-12, %v1967_v43 }
0x11a7   :  { %v1968_v47 = vadd.f32 1e-12, %v1966_v45 }
0x11a8   :  { %4585 = vrsqrt.f32 %v1969_v46 }
0x11a9   :  { %4587 = vrsqrt.f32 %v1968_v47 }
0x11b2   :  { %v4586_v52 = vpop.eup %4585 }
0x11b3   :  { %v4588_v53 = vpop.eup %4587  ;;  %v1973_v54 = vmul.f32 %v4586_v52, %v1957_v41 }
0x11b4   :  { %v1972_v55 = vmul.f32 %v4588_v53, %v1956_v24 }
0x11b5   :  { %v1979_v59 = vmul.f32 %v1977_v51, %v1973_v54 }
0x11b6   :  { %v1978_v40 = vmul.f32 %v1977_v51, %v1972_v55 }
0x11b7   :  { %v5142_v61 = vadd.f32 %v1983_v57, %v1979_v59 }
0x11b8   :  { %v5140_v60 = vadd.f32 %v1983_v57, %v1978_v40 }
0x11ba   :  { %4297 = vmatprep.mubr.msk.f32.mxu1 %vm72_vm0, %v5140_v60 }
0x11bb   :  { %4298 = vmatmul.mubr.msk.f32.vlgmr.msra.gmra.mrb[22].mxu1 %vm72_vm0, %v5142_v61 }
0x11bc   :  { %4302 = vmatprep.mubr.msk.f32.mxu1 %vm4710_vm1, %v4709_v36 }
0x128e   :  { %v4299_v34 = vpop.f32.mrb[22].mxu1 }
0x128f   :  { %v5153_v63 = vadd.f32 %v4299_v34, %v3977_v62  ;;  %v2073_v1 = vpop.f32.mrb[23].mxu1 }
0x1290   :  { %v5155_v2 = vadd.f32 %v3977_v62, %v2073_v1 }
0x1291   :  { %2160 = vrot.lane.b32.xlu1 %v5153_v63, %s4711_s21 }
0x1292   :  { %2083 = vrot.lane.b32.xlu0 %v5155_v2, %s4711_s21  ;;  %s5459_s21 = smov 16  }
0x1303   :  { %v2161_v4 = vpop.permute.xlu1 %2160 }
0x1304   :  { %v2084_v3 = vpop.permute.xlu0 %2083 }
0x1305   :  { %4301 = vmatpush3.xpose.msk.msra.mxu1 %vm237_vm2, %v2084_v3 }
0x1306   :  { %4305 = vmatprep.subr.mxu1 %v4709_v36 }
0x1308   :  { %4303 = vmatmul.mubr.msk.f32.vlgmr.msra.gmra.mrb[24].mxu1 %vm237_vm2, %v5155_v2 }
0x1309   :  { %4306 = vmatpush3.xpose.msk.msra.mxu1 %vm237_vm2, %v2161_v4  ;;  %4307 = vmatprep.mubr.msk.f32.mxu1 %vm4710_vm1, %v4709_v36 }
0x130a   :  { %4315 = vmatprep.subr.mxu1 %v4709_v36 }
0x130c   :  { %4308 = vmatmul.mubr.msk.f32.vlgmr.msra.gmra.mrb[26].mxu1 %vm237_vm2, %v5153_v63 }
0x130d   :  { %4317 = vmatprep.mubr.msk.f32.mxu1 %vm4710_vm1, %v4709_v36 }
0x13db   :  { %v2155_v5 = vpop.f32.mrb[24].mxu1 }
0x13dc   :  { %v2236_v6 = vmul.f32 0.35355338, %v2155_v5  ;;  %v4304_v7 = vpop.f32.mrb[25].mxu1 }
0x13de   :  { %v2238_v8 = vadd.f32 %v2236_v6, %v4881_v58 }
0x13df   :  { %v2232_v35 = vpop.f32.mrb[26].mxu1 }
0x13e0   :  { %v2237_v33 = vmul.f32 0.35355338, %v2232_v35  ;;  %v4309_v11 = vpop.f32.mrb[27].mxu1  ;;  %v2240_v12 = vsel %vm237_vm2, %v2238_v8, -inf }
0x13e1   :  { %2241 = vmax.xlane.f32.xlu1 %v2240_v12 }
0x13e2   :  { %v2239_v13 = vadd.f32 %v2237_v33, %v4885_v0 }
0x13e4   :  { %v2243_v14 = vsel %vm237_vm2, %v2239_v13, -inf }
0x13e5   :  { %2244 = vmax.xlane.f32.xlu0 %v2243_v14 }
0x13f2   :  { %2338 = vrot.lane.b32.xlu1 %v5153_v63, %s4713_s1 }
0x13f6   :  { %2416 = vrot.lane.b32.xlu1 %v5155_v2, %s4714_s25 }
0x13fa   :  { %2494 = vrot.lane.b32.xlu1 %v5153_v63, %s4714_s25 }
0x13fb   :  { %2262 = vrot.lane.b32.xlu0 %v5155_v2, %s4713_s1 }
0x146e   :  { %v2242_v15 = vpop.xlane.xlu1 %2241 }
0x146f   :  { %v2246_v39 = vsub.f32 %v2238_v8, %v2242_v15 }
0x1471   :  { %v2248_v10 = vmul.f32 1.442695, %v2246_v39 }
0x1472   :  { %v2339_v16 = vpop.permute.xlu1 %2338  ;;  %v2245_v17 = vpop.xlane.xlu0 %2244 }
0x1473   :  { %4589 = vpow2.f32 %v2248_v10  ;;  %v2247_v18 = vsub.f32 %v2239_v13, %v2245_v17  ;;  %4316 = vmatpush3.msra.mxu1 %v2339_v16 }
0x1474   :  { %4325 = vmatprep.subr.mxu1 %v4709_v36 }
0x1475   :  { %v2250_v21 = vmul.f32 1.442695, %v2247_v18 }
0x1476   :  { %v2263_v22 = vpop.permute.xlu0 %2262  ;;  %v2417_v26 = vpop.permute.xlu1 %2416 }
0x1477   :  { %4591 = vpow2.f32 %v2250_v21  ;;  %4311 = vmatpush3.msra.mxu0 %v2263_v22 }
0x1478   :  { %4320 = vmatprep.subr.mxu0 %v4709_v36 }
0x147a   :  { %v2495_v28 = vpop.permute.xlu1 %2494 }
0x147d   :  { %v4590_v23 = vpop.eup %4589 }
0x147e   :  { %v2252_v41 = vsel %vm237_vm2, %v4590_v23, 0.0 }
0x147f   :  { %2253 = vadd.xlane.f32.xlu0 %v2252_v41 }
0x1481   :  { %v4592_v24 = vpop.eup %4591 }
0x1482   :  { %v2255_v25 = vsel %vm237_vm2, %v4592_v24, 0.0 }
0x1483   :  { %2256 = vadd.xlane.f32.xlu1 %v2255_v25 }
0x1494   :  { %2492 = vrot.lane.b32.xlu1 %v5153_v63, %s4715_s26 }
0x1495   :  { %2414 = vrot.lane.b32.xlu0 %v5155_v2, %s4715_s26 }
0x150c   :  { %v2254_v29 = vpop.xlane.xlu0 %2253 }
0x150d   :  { %4593 = vrcp.f32 %v2254_v29 }
0x1510   :  { %v2257_v27 = vpop.xlane.xlu1 %2256  ;;  %v2415_v38 = vpop.permute.xlu0 %2414 }
0x1511   :  { %4595 = vrcp.f32 %v2257_v27 }
0x1514   :  { %v2493_v42 = vpop.permute.xlu1 %2492 }
0x1517   :  { %v4594_v30 = vpop.eup %4593 }
0x1518   :  { %v2260_v31 = vmul.f32 %v4594_v30, %v4590_v23 }
0x151a   :  { %4313 = vmatmul.mubr.msk.f32.vlgmr.msra.gmra.mrb[18].mxu0 %vm237_vm2, %v2260_v31 }
0x151b   :  { %v4596_v32 = vpop.eup %4595  ;;  %4321 = vmatpush3.xpose.msk.msra.mxu0 %vm237_vm2, %v2417_v26  ;;  %4322 = vmatprep.mubr.msk.f32.mxu0 %vm4710_vm1, %v4709_v36 }
0x151c   :  { %v2261_v37 = vmul.f32 %v4596_v32, %v4592_v24  ;;  %4330 = vmatprep.subr.mxu0 %v4709_v36 }
0x151e   :  { %4318 = vmatmul.mubr.msk.f32.vlgmr.msra.gmra.mrb[28].mxu1 %vm237_vm2, %v2261_v37  ;;  %4323 = vmatmul.mubr.msk.f32.vlgmr.msra.gmra.mrb[20].mxu0 %vm237_vm2, %v2415_v38 }
0x151f   :  { %4326 = vmatpush3.xpose.msk.msra.mxu1 %vm237_vm2, %v2495_v28  ;;  %4327 = vmatprep.mubr.msk.f32.mxu1 %vm4710_vm1, %v4709_v36 }
0x1520   :  { %4335 = vmatprep.subr.mxu1 %v4709_v36  ;;  %4332 = vmatprep.mubr.msk.f32.mxu0 %vm4710_vm1, %v4709_v36 }
0x1522   :  { %4328 = vmatmul.mubr.msk.f32.vlgmr.msra.gmra.mrb[30].mxu1 %vm237_vm2, %v2493_v42 }
0x1523   :  { %4337 = vmatprep.mubr.msk.f32.mxu1 %vm4710_vm1, %v4709_v36 }
0x15ed   :  { %v5209_v43 = vpop.f32.mrb[18].mxu0 }
0x15ee   :  { %v4314_v44 = vpop.f32.mrb[19].mxu0 }
0x15f1   :  { %v5211_v45 = vpop.f32.mrb[28].mxu1  ;;  %v2488_v46 = vpop.f32.mrb[20].mxu0 }
0x15f2   :  { %v2570_v47 = vmul.f32 0.35355338, %v2488_v46  ;;  %v4319_v51 = vpop.f32.mrb[29].mxu1  ;;  %v4324_v52 = vpop.f32.mrb[21].mxu0 }
0x15f4   :  { %v2572_v53 = vadd.f32 %v2570_v47, %v4881_v58 }
0x15f5   :  { %v2566_v54 = vpop.f32.mrb[30].mxu1 }
0x15f6   :  { %v2571_v55 = vmul.f32 0.35355338, %v2566_v54  ;;  %v4329_v57 = vpop.f32.mrb[31].mxu1  ;;  %v2574_v59 = vsel %vm237_vm2, %v2572_v53, -inf }
0x15f7   :  { %2575 = vmax.xlane.f32.xlu0 %v2574_v59 }
0x15f8   :  { %v2573_v40 = vadd.f32 %v2571_v55, %v4885_v0 }
0x15fa   :  { %v2577_v62 = vsel %vm237_vm2, %v2573_v40, -inf }
0x15fb   :  { %2578 = vmax.xlane.f32.xlu1 %v2577_v62 }
0x160c   :  { %2672 = vrot.lane.b32.xlu1 %v5153_v63, %s4716_s27 }
0x160d   :  { %2596 = vrot.lane.b32.xlu0 %v5155_v2, %s4716_s27 }
0x1610   :  { %2750 = vrot.lane.b32.xlu1 %v5155_v2, %s4717_s0 }
0x1614   :  { %2828 = vrot.lane.b32.xlu1 %v5153_v63, %s4717_s0 }
0x1618   :  { %2826 = vrot.lane.b32.xlu1 %v5153_v63, %s4718_s22 }
0x1684   :  { %v2576_v34 = vpop.xlane.xlu0 %2575 }
0x1685   :  { %v2580_v1 = vsub.f32 %v2572_v53, %v2576_v34 }
0x1687   :  { %v2582_v3 = vmul.f32 1.442695, %v2580_v1 }
0x1688   :  { %v2597_v4 = vpop.permute.xlu0 %2596  ;;  %v2579_v5 = vpop.xlane.xlu1 %2578 }
0x1689   :  { %4597 = vpow2.f32 %v2582_v3  ;;  %v2581_v6 = vsub.f32 %v2573_v40, %v2579_v5  ;;  %4331 = vmatpush3.msra.mxu0 %v2597_v4 }
0x168a   :  { %4340 = vmatprep.subr.mxu0 %v4709_v36 }
0x168b   :  { %v2584_v7 = vmul.f32 1.442695, %v2581_v6 }
0x168c   :  { %v2673_v8 = vpop.permute.xlu1 %2672 }
0x168d   :  { %4599 = vpow2.f32 %v2584_v7  ;;  %4336 = vmatpush3.msra.mxu1 %v2673_v8 }
0x168e   :  { %4345 = vmatprep.subr.mxu1 %v4709_v36 }
0x1690   :  { %v2751_v15 = vpop.permute.xlu1 %2750 }
0x1693   :  { %v4598_v35 = vpop.eup %4597 }
0x1694   :  { %v2586_v33 = vsel %vm237_vm2, %v4598_v35, 0.0  ;;  %v2829_v17 = vpop.permute.xlu1 %2828 }
0x1695   :  { %2587 = vadd.xlane.f32.xlu0 %v2586_v33 }
0x1697   :  { %v4600_v11 = vpop.eup %4599 }
0x1698   :  { %v2589_v12 = vsel %vm237_vm2, %v4600_v11, 0.0  ;;  %v2827_v22 = vpop.permute.xlu1 %2826 }
0x1699   :  { %2590 = vadd.xlane.f32.xlu0 %v2589_v12 }
0x16af   :  { %2748 = vrot.lane.b32.xlu0 %v5155_v2, %s4718_s22 }
0x1722   :  { %v2588_v13 = vpop.xlane.xlu0 %2587 }
0x1723   :  { %4601 = vrcp.f32 %v2588_v13 }
0x1726   :  { %v2591_v14 = vpop.xlane.xlu0 %2590 }
0x1727   :  { %4603 = vrcp.f32 %v2591_v14 }
0x172a   :  { %v2749_v21 = vpop.permute.xlu0 %2748 }
0x172d   :  { %v4602_v39 = vpop.eup %4601 }
0x172e   :  { %v2594_v10 = vmul.f32 %v4602_v39, %v4598_v35 }
0x1730   :  { %4333 = vmatmul.mubr.msk.f32.vlgmr.msra.gmra.mrb[22].mxu0 %vm237_vm2, %v2594_v10 }
0x1731   :  { %v4604_v16 = vpop.eup %4603  ;;  %4341 = vmatpush3.xpose.msk.msra.mxu0 %vm237_vm2, %v2751_v15  ;;  %4342 = vmatprep.mubr.msk.f32.mxu0 %vm4710_vm1, %v4709_v36 }
0x1732   :  { %v2595_v18 = vmul.f32 %v4604_v16, %v4600_v11  ;;  %4350 = vmatprep.subr.mxu0 %v4709_v36 }
0x1734   :  { %4338 = vmatmul.mubr.msk.f32.vlgmr.msra.gmra.mrb[32].mxu1 %vm237_vm2, %v2595_v18  ;;  %4343 = vmatmul.mubr.msk.f32.vlgmr.msra.gmra.mrb[24].mxu0 %vm237_vm2, %v2749_v21 }
0x1735   :  { %4346 = vmatpush3.xpose.msk.msra.mxu1 %vm237_vm2, %v2829_v17  ;;  %4347 = vmatprep.mubr.msk.f32.mxu1 %vm4710_vm1, %v4709_v36 }
0x1736   :  { %4355 = vmatprep.subr.mxu1 %v4709_v36  ;;  %4352 = vmatprep.mubr.msk.f32.mxu0 %vm4710_vm1, %v4709_v36 }
0x1738   :  { %4348 = vmatmul.mubr.msk.f32.vlgmr.msra.gmra.mrb[34].mxu1 %vm237_vm2, %v2827_v22 }
0x1739   :  { %4357 = vmatprep.mubr.msk.f32.mxu1 %vm4710_vm1, %v4709_v36 }
0x1803   :  { %v5249_v23 = vpop.f32.mrb[22].mxu0 }
0x1804   :  { %v4334_v41 = vpop.f32.mrb[23].mxu0 }
0x1807   :  { %v5251_v24 = vpop.f32.mrb[32].mxu1  ;;  %v2822_v25 = vpop.f32.mrb[24].mxu0 }
0x1808   :  { %v2904_v26 = vmul.f32 0.35355338, %v2822_v25  ;;  %v4339_v28 = vpop.f32.mrb[33].mxu1  ;;  %v4344_v29 = vpop.f32.mrb[25].mxu0 }
0x180a   :  { %v2906_v27 = vadd.f32 %v2904_v26, %v4881_v58 }
0x180b   :  { %v2900_v30 = vpop.f32.mrb[34].mxu1 }
0x180c   :  { %v2905_v31 = vmul.f32 0.35355338, %v2900_v30  ;;  %v4349_v32 = vpop.f32.mrb[35].mxu1  ;;  %v2908_v37 = vsel %vm237_vm2, %v2906_v27, -inf }
0x180d   :  { %2909 = vmax.xlane.f32.xlu0 %v2908_v37 }
0x180e   :  { %v2907_v38 = vadd.f32 %v2905_v31, %v4885_v0 }
0x1810   :  { %v2911_v42 = vsel %vm237_vm2, %v2907_v38, -inf }
0x1811   :  { %2912 = vmax.xlane.f32.xlu1 %v2911_v42 }
0x1822   :  { %3006 = vrot.lane.b32.xlu1 %v5153_v63, %s4719_s2 }
0x1823   :  { %2930 = vrot.lane.b32.xlu0 %v5155_v2, %s4719_s2 }
0x1826   :  { %3084 = vrot.lane.b32.xlu1 %v5155_v2, %s4720_s28 }
0x182a   :  { %3162 = vrot.lane.b32.xlu1 %v5153_v63, %s4720_s28 }
0x182e   :  { %3160 = vrot.lane.b32.xlu1 %v5153_v63, %s4721_s29 }
0x189a   :  { %v2910_v44 = vpop.xlane.xlu0 %2909 }
0x189b   :  { %v2914_v46 = vsub.f32 %v2906_v27, %v2910_v44 }
0x189d   :  { %v2916_v47 = vmul.f32 1.442695, %v2914_v46 }
0x189e   :  { %v2931_v51 = vpop.permute.xlu0 %2930  ;;  %v2913_v52 = vpop.xlane.xlu1 %2912 }
0x189f   :  { %4605 = vpow2.f32 %v2916_v47  ;;  %v2915_v53 = vsub.f32 %v2907_v38, %v2913_v52  ;;  %4351 = vmatpush3.msra.mxu0 %v2931_v51  ;;  %v4005_v47 = vld [vmem:[%s5443_s5 + $0x28] sm:$0xff]  ;;  %v4006_v52 = vld [vmem:[%s5443_s5 + $0x30] sm:$0xff] }
0x18a0   :  { %4360 = vmatprep.subr.mxu0 %v4709_v36 }
0x18a1   :  { %v2918_v54 = vmul.f32 1.442695, %v2915_v53  ;;  %v4007_v53 = vld [vmem:[%s5443_s5 + $0x38] sm:$0xff] }
0x18a2   :  { %v3007_v55 = vpop.permute.xlu1 %3006 }
0x18a3   :  { %4607 = vpow2.f32 %v2918_v54  ;;  %4356 = vmatpush3.msra.mxu1 %v3007_v55  ;;  %v4484_v54 = vpack.c.bf16 %v4007_v53, %v4006_v52 }
0x18a4   :  { %4365 = vmatprep.subr.mxu1 %v4709_v36 }
0x18a6   :  { %v3085_v3 = vpop.permute.xlu1 %3084 }
0x18a9   :  { %v4606_v57 = vpop.eup %4605 }
0x18aa   :  { %v2920_v59 = vsel %vm237_vm2, %v4606_v57, 0.0  ;;  %v3163_v7 = vpop.permute.xlu1 %3162 }
0x18ab   :  { %2921 = vadd.xlane.f32.xlu0 %v2920_v59 }
0x18ad   :  { %v4608_v40 = vpop.eup %4607 }
0x18ae   :  { %v2923_v62 = vsel %vm237_vm2, %v4608_v40, 0.0  ;;  %v3161_v33 = vpop.permute.xlu1 %3160 }
0x18af   :  { %2924 = vadd.xlane.f32.xlu0 %v2923_v62 }
0x18c5   :  { %3082 = vrot.lane.b32.xlu0 %v5155_v2, %s4721_s29  ;;  %s5460_s29 = smov 24  }
0x1938   :  { %v2922_v34 = vpop.xlane.xlu0 %2921 }
0x1939   :  { %4609 = vrcp.f32 %v2922_v34 }
0x193c   :  { %v2925_v1 = vpop.xlane.xlu0 %2924 }
0x193d   :  { %4611 = vrcp.f32 %v2925_v1 }
0x1940   :  { %v3083_v35 = vpop.permute.xlu0 %3082 }
0x1943   :  { %v4610_v4 = vpop.eup %4609 }
0x1944   :  { %v2928_v5 = vmul.f32 %v4610_v4, %v4606_v57 }
0x1946   :  { %4353 = vmatmul.mubr.msk.f32.vlgmr.msra.gmra.mrb[26].mxu0 %vm237_vm2, %v2928_v5 }
0x1947   :  { %v4612_v6 = vpop.eup %4611  ;;  %4361 = vmatpush3.xpose.msk.msra.mxu0 %vm237_vm2, %v3085_v3  ;;  %4362 = vmatprep.mubr.msk.f32.mxu0 %vm4710_vm1, %v4709_v36 }
0x1948   :  { %v2929_v8 = vmul.f32 %v4612_v6, %v4608_v40  ;;  %4370 = vmatprep.subr.mxu0 %v4709_v36 }
0x194a   :  { %4358 = vmatmul.mubr.msk.f32.vlgmr.msra.gmra.mrb[36].mxu1 %vm237_vm2, %v2929_v8  ;;  %4363 = vmatmul.mubr.msk.f32.vlgmr.msra.gmra.mrb[28].mxu0 %vm237_vm2, %v3083_v35 }
0x194b   :  { %4366 = vmatpush3.xpose.msk.msra.mxu1 %vm237_vm2, %v3163_v7  ;;  %4367 = vmatprep.mubr.msk.f32.mxu1 %vm4710_vm1, %v4709_v36 }
0x194c   :  { %4375 = vmatprep.subr.mxu1 %v4709_v36  ;;  %4372 = vmatprep.mubr.msk.f32.mxu0 %vm4710_vm1, %v4709_v36 }
0x194e   :  { %4368 = vmatmul.mubr.msk.f32.vlgmr.msra.gmra.mrb[38].mxu1 %vm237_vm2, %v3161_v33 }
0x194f   :  { %4377 = vmatprep.mubr.msk.f32.mxu1 %vm4710_vm1, %v4709_v36 }
0x1a19   :  { %v3002_v11 = vpop.f32.mrb[26].mxu0 }
0x1a1a   :  { %v4354_v12 = vpop.f32.mrb[27].mxu0 }
0x1a1d   :  { %v3078_v13 = vpop.f32.mrb[36].mxu1  ;;  %v3156_v14 = vpop.f32.mrb[28].mxu0 }
0x1a1e   :  { %v3238_v15 = vmul.f32 0.35355338, %v3156_v14  ;;  %v4359_v39 = vpop.f32.mrb[37].mxu1  ;;  %v4364_v10 = vpop.f32.mrb[29].mxu0 }
0x1a20   :  { %v3240_v16 = vadd.f32 %v3238_v15, %v4881_v58 }
0x1a21   :  { %v3234_v17 = vpop.f32.mrb[38].mxu1 }
0x1a22   :  { %v3239_v18 = vmul.f32 0.35355338, %v3234_v17  ;;  %v4369_v21 = vpop.f32.mrb[39].mxu1  ;;  %v3242_v22 = vsel %vm237_vm2, %v3240_v16, -inf }
0x1a23   :  { %3243 = vmax.xlane.f32.xlu0 %v3242_v22 }
0x1a24   :  { %v3241_v41 = vadd.f32 %v3239_v18, %v4885_v0 }
0x1a26   :  { %v3245_v25 = vsel %vm237_vm2, %v3241_v41, -inf }
0x1a27   :  { %3246 = vmax.xlane.f32.xlu1 %v3245_v25 }
0x1a38   :  { %3340 = vrot.lane.b32.xlu1 %v5153_v63, %s4722_s30 }
0x1a3c   :  { %3418 = vrot.lane.b32.xlu1 %v5249_v23, %s5458_s4 }
0x1a40   :  { %3420 = vrot.lane.b32.xlu1 %v5251_v24, %s5458_s4 }
0x1a44   :  { %3428 = vrot.lane.b32.xlu1 %v3078_v13, %s5459_s21 }
0x1ab0   :  { %v3244_v36 = vpop.xlane.xlu0 %3243 }
0x1ab1   :  { %v3248_v58 = vsub.f32 %v3240_v16, %v3244_v36 }
0x1ab3   :  { %v3250_v26 = vmul.f32 1.442695, %v3248_v58 }
0x1ab4   :  { %v3247_v28 = vpop.xlane.xlu1 %3246 }
0x1ab5   :  { %4613 = vpow2.f32 %v3250_v26  ;;  %v3249_v0 = vsub.f32 %v3241_v41, %v3247_v28  ;;  %v4011_v28 = vld [vmem:[%s5444_s6 + $0x28] sm:$0xff] }
0x1ab7   :  { %v3252_v29 = vmul.f32 1.442695, %v3249_v0 }
0x1ab8   :  { %v3341_v27 = vpop.permute.xlu1 %3340 }
0x1ab9   :  { %4615 = vpow2.f32 %v3252_v29  ;;  %4376 = vmatpush3.msra.mxu1 %v3341_v27  ;;  %v4012_v29 = vld [vmem:[%s5444_s6 + $0x30] sm:$0xff]  ;;  %v4013_v27 = vld [vmem:[%s5444_s6 + $0x38] sm:$0xff] }
0x1abc   :  { %v3419_v62 = vpop.permute.xlu1 %3418 }
0x1abd   :  { %v3440_v3 = vsel %vm237_vm2, %v5209_v43, %v3419_v62  ;;  %v5334_v43 = vld [vmem:[%s5446_s8 + $0x8] sm:$0x3f]  ;;  %v4022_v62 = vld [vmem:[%s5445_s7 + $0x60] sm:$0xff] }
0x1abe   :  { %v3454_v12 = vrot.slane %v5334_v43, %v4878_v56 }
0x1abf   :  { %v4614_v30 = vpop.eup %4613 }
0x1ac0   :  { %v3254_v63 = vsel %vm237_vm2, %v4614_v30, 0.0  ;;  %v3421_v34 = vpop.permute.xlu1 %3420 }
0x1ac1   :  { %3255 = vadd.xlane.f32.xlu0 %v3254_v63  ;;  %v3441_v8 = vsel %vm237_vm2, %v5211_v45, %v3421_v34  ;;  %v4023_v34 = vld [vmem:[%s5445_s7 + $0x68] sm:$0xff] }
0x1ac3   :  { %v4616_v23 = vpop.eup %4615 }
0x1ac4   :  { %v3257_v31 = vsel %vm237_vm2, %v4616_v23, 0.0  ;;  %v3429_v4 = vpop.permute.xlu1 %3428 }
0x1ac5   :  { %3258 = vadd.xlane.f32.xlu0 %v3257_v31  ;;  %v3443_v35 = vsel %vm1607_vm4, %v3441_v8, %v3429_v4  ;;  %v4025_v4 = vld [vmem:[%s5445_s7 + $0x78] sm:$0xff] }
0x1adb   :  { %3264 = vrot.lane.b32.xlu0 %v5155_v2, %s4722_s30  ;;  %v4004_v2 = vld [vmem:[%s5443_s5 + $0x20] sm:$0xff] }
0x1adc   :  { %v4480_v51 = vpack.c.bf16 %v4005_v47, %v4004_v2 }
0x1adf   :  { %3426 = vrot.lane.b32.xlu0 %v3002_v11, %s5459_s21 }
0x1b4e   :  { %v3256_v24 = vpop.xlane.xlu0 %3255 }
0x1b4f   :  { %4617 = vrcp.f32 %v3256_v24 }
0x1b52   :  { %v3259_v32 = vpop.xlane.xlu0 %3258 }
0x1b53   :  { %4619 = vrcp.f32 %v3259_v32 }
0x1b56   :  { %v3265_v37 = vpop.permute.xlu0 %3264 }
0x1b57   :  { %4371 = vmatpush3.msra.mxu0 %v3265_v37 }
0x1b58   :  { %4481 = vmatprep.subr.bf16.mxu0 %v4480_v51 }
0x1b59   :  { %v4618_v38 = vpop.eup %4617 }
0x1b5a   :  { %v3262_v42 = vmul.f32 %v4618_v38, %v4614_v30  ;;  %v3427_v1 = vpop.permute.xlu0 %3426  ;;  %v4492_v30 = vpack.c.bf16 %v4013_v27, %v4012_v29  ;;  %v3567_v38 = vrot.slane %v5334_v43, %v1732_v19  ;;  %v4018_v19 = vld [vmem:[%s5445_s7 + $0x40] sm:$0xff] }
0x1b5b   :  { %v3442_v5 = vsel %vm1607_vm4, %v3440_v3, %v3427_v1  ;;  %v4504_v1 = vpack.c.bf16 %v4023_v34, %v4022_v62  ;;  %v4024_v3 = vld [vmem:[%s5445_s7 + $0x70] sm:$0xff]  ;;  %v3813_v62 = vrot.slane %v5334_v43, %v1976_v49  ;;  %v4028_v49 = vld [vmem:[%s5449_s11] ss:$0 sm:$0xff] }
0x1b5c   :  { %4373 = vmatmul.mubr.msk.f32.vlgmr.msra.gmra.mrb[30].mxu0 %vm237_vm2, %v3262_v42 }
0x1b5d   :  { %v4620_v44 = vpop.eup %4619  ;;  %4483 = vmatpush3.bf16.msra.mxu0 %v4480_v51 }
0x1b5e   :  { %v3263_v46 = vmul.f32 %v4620_v44, %v4616_v23  ;;  %4485 = vmatprep.subr.bf16.mxu0 %v4484_v54 }
0x1b60   :  { %4378 = vmatmul.mubr.msk.f32.vlgmr.msra.gmra.mrb[40].mxu1 %vm237_vm2, %v3263_v46  ;;  %v3573_v46 = vrot.slane %v5334_v43, %v1738_v20  ;;  %v4020_v20 = vld [vmem:[%s5445_s7 + $0x50] sm:$0xff] }
0x1b61   :  { %4487 = vmatpush3.bf16.msra.mxu0 %v4484_v54 }
0x1c2f   :  { %v3336_v55 = vpop.f32.mrb[30].mxu0 }
0x1c30   :  { %3434 = vrot.lane.b32.xlu0 %v3336_v55, %s5460_s29  ;;  %v4374_v57 = vpop.f32.mrb[31].mxu0  ;;  %v4019_v55 = vld [vmem:[%s5445_s7 + $0x48] sm:$0xff] }
0x1c31   :  { %v4496_v57 = vpack.c.bf16 %v4019_v55, %v4018_v19 }
0x1c33   :  { %v3412_v59 = vpop.f32.mrb[40].mxu1  ;;  %4497 = vmatprep.subr.bf16.mxu0 %v4496_v57 }
0x1c34   :  { %3436 = vrot.lane.b32.xlu1 %v3412_v59, %s5460_s29  ;;  %v4379_v40 = vpop.f32.mrb[41].mxu1  ;;  %v4021_v59 = vld [vmem:[%s5445_s7 + $0x58] sm:$0xff] }
0x1c35   :  { %v4500_v40 = vpack.c.bf16 %v4021_v59, %v4020_v20 }
0x1ca2   :  { %v3435_v6 = vpop.permute.xlu0 %3434 }
0x1ca3   :  { %v3444_v7 = vsel %vm1610_vm3, %v3442_v5, %v3435_v6  ;;  %v4508_v5 = vpack.c.bf16 %v4025_v4, %v4024_v3  ;;  %v4015_v6 = vld [vmem:[%s5447_s9 + $0x1] ss:$0 sm:$0xff] }
0x1ca4   :  { %4388 = vmatprep.mubr.msk.f32.mxu0 %vm72_vm0, %v3444_v7 }
0x1ca6   :  { %v3437_v33 = vpop.permute.xlu1 %3436 }
0x1ca7   :  { %v3445_v11 = vsel %vm1610_vm3, %v3443_v35, %v3437_v33 }
0x1ca8   :  { %4389 = vmatmul.mubr.msk.f32.vlgmr.msra.gmra.mrb[32].mxu0 %vm72_vm0, %v3445_v11 }
0x1ca9   :  { %4499 = vmatpush3.bf16.msra.mxu0 %v4496_v57 }
0x1caa   :  { %4501 = vmatprep.subr.bf16.mxu0 %v4500_v40 }
0x1cad   :  { %4503 = vmatpush3.bf16.msra.mxu0 %v4500_v40 }
0x1cae   :  { %4505 = vmatprep.subr.bf16.mxu0 %v4504_v1 }
0x1cb1   :  { %4507 = vmatpush3.bf16.msra.mxu0 %v4504_v1 }
0x1cb2   :  { %4509 = vmatprep.subr.bf16.mxu0 %v4508_v5 }
0x1cb5   :  { %4511 = vmatpush3.bf16.msra.mxu0 %v4508_v5  ;;  %v3819_v5 = vrot.slane %v5334_v43, %v1982_v50 }
0x1d7b   :  { %v4390_v13 = vpop.f32.mrb[32].mxu0 }
0x1d7c   :  { %v3533_v14 = vadd.f32 %v4390_v13, %v3454_v12  ;;  %v3527_v15 = vpop.f32.mrb[33].mxu0 }
0x1d7d   :  { %v3528_v39 = vadd.f32 %v3527_v15, %v3454_v12 }
0x1d7e   :  { %v3537_v45 = vadd.f32 %v3533_v14, %v5142_v61 }
0x1d7f   :  { %v3536_v10 = vadd.f32 %v3528_v39, %v5140_v60  ;;  %v4010_v60 = vld [vmem:[%s5444_s6 + $0x20] sm:$0xff]  ;;  %s4725_s6 = smov [#allocation7]  }
0x1d80   :  { %v3541_v16 = vsel %vm72_vm0, %v3537_v45, 0.0  ;;  %v4488_v0 = vpack.c.bf16 %v4011_v28, %v4010_v60  ;;  %s3921_s23 = sshll.u32 %s4725_s6, 4  ;;  %s3922_s23 = int_to_ptr.vmem [resolvable:$true] %s3921_s23 }
0x1d81   :  { %3542 = vadd.xlane.f32.xlu1 %v3541_v16  ;;  %v3538_v17 = vsel %vm72_vm0, %v3536_v10, 0.0  ;;  %s4677_s24 = scalar_lea.vmem %s3922_s23, 256  ;;  %p4682_p3 = scmp.lt.s32.totalorder %s3922_s23, %s3922_s23 }
0x1d82   :  { %3539 = vadd.xlane.f32.xlu0 %v3538_v17  ;;  %4489 = vmatprep.subr.bf16.mxu1 %v4488_v0  ;;  %p4678_p2 = scmp.ne.s32.totalorder %s3922_s23, %s4677_s24  ;;  %p4683_p4 = scmp.lt.s32.totalorder %s4677_s24, %s4677_s24 }
0x1d83   :  { %4491 = vmatpush3.bf16.msra.mxu1 %v4488_v0 }
0x1d84   :  { %4493 = vmatprep.subr.bf16.mxu1 %v4492_v30  ;;  %p4684_p5 = por %p4683_p4, %p4682_p3 }
0x1d86   :  { %p4685_p6 = pnand %p4684_p5, %p4678_p2 }
0x1d87   :  { %4495 = vmatpush3.bf16.msra.mxu1 %v4492_v30 }
0x1e0e   :  { %v3543_v18 = vpop.xlane.xlu1 %3542 }
0x1e0f   :  { %v3545_v21 = vmul.f32 0.03125, %v3543_v18  ;;  %v3540_v22 = vpop.xlane.xlu0 %3539 }
0x1e10   :  { %v3544_v41 = vmul.f32 0.03125, %v3540_v22 }
0x1e11   :  { %v3547_v25 = vsub.f32 %v3537_v45, %v3545_v21 }
0x1e12   :  { %v3546_v56 = vsub.f32 %v3536_v10, %v3544_v41 }
0x1e13   :  { %v3549_v26 = vmul.f32 %v3547_v25, %v3547_v25 }
0x1e14   :  { %v3548_v36 = vmul.f32 %v3546_v56, %v3546_v56 }
0x1e15   :  { %v3553_v61 = vsel %vm72_vm0, %v3549_v26, 0.0  ;;  %v3700_v26 = vrot.slane %v5334_v43, %v1862_v9 }
0x1e16   :  { %v3550_v58 = vsel %vm72_vm0, %v3548_v36, 0.0 }
0x1e17   :  { %3551 = vadd.xlane.f32.xlu0 %v3550_v58 }
0x1e1b   :  { %3554 = vadd.xlane.f32.xlu0 %v3553_v61 }
0x1ea4   :  { %v3552_v63 = vpop.xlane.xlu0 %3551 }
0x1ea5   :  { %v3556_v23 = vmul.f32 0.03125, %v3552_v63 }
0x1ea7   :  { %v3558_v31 = vadd.f32 1e-12, %v3556_v23 }
0x1ea8   :  { %v3555_v24 = vpop.xlane.xlu0 %3554 }
0x1ea9   :  { %4621 = vrsqrt.f32 %v3558_v31  ;;  %v3557_v32 = vmul.f32 0.03125, %v3555_v24 }
0x1eab   :  { %v3559_v37 = vadd.f32 1e-12, %v3557_v32 }
0x1ead   :  { %4623 = vrsqrt.f32 %v3559_v37 }
0x1eb3   :  { %v4622_v42 = vpop.eup %4621 }
0x1eb4   :  { %v3562_v44 = vmul.f32 %v4622_v42, %v3546_v56 }
0x1eb6   :  { %v3568_v2 = vmul.f32 %v3567_v38, %v3562_v44 }
0x1eb7   :  { %v4624_v47 = vpop.eup %4623 }
0x1eb8   :  { %v3563_v51 = vmul.f32 %v4624_v47, %v3547_v25  ;;  %v3574_v52 = vadd.f32 %v3573_v46, %v3568_v2  ;;  %v3822_v2 = vld [vmem:[%s5448_s10] sm:$0xff]  ;;  %v3823_v47 = vld [vmem:[%s5448_s10 + $0x8] sm:$0xff] }
0x1eba   :  { %v3569_v53 = vmul.f32 %v3567_v38, %v3563_v51  ;;  %4399 = vmatprep.mubr.msk.f32.mxu1 %vm72_vm0, %v3574_v52  ;;  %v4512_v51 = vpack.c.bf16 %v3823_v47, %v3822_v2 }
0x1ebc   :  { %v3575_v54 = vadd.f32 %v3573_v46, %v3569_v53  ;;  %v3825_v53 = vld [vmem:[%s5448_s10 + $0x18] sm:$0xff]  ;;  %4513 = vmatprep.subr.bf16.mxu1 %v4512_v51 }
0x1ebe   :  { %4400 = vmatmul.mubr.msk.f32.vlgmr.msra.gmra.mrb[42].mxu1 %vm72_vm0, %v3575_v54 }
0x1ebf   :  { %4515 = vmatpush3.bf16.msra.mxu1 %v4512_v51 }
0x1f91   :  { %v4401_v7 = vpop.f32.mrb[42].mxu1 }
0x1f92   :  { %v3667_v8 = vadd.f32 %v4401_v7, %v4015_v6  ;;  %v3661_v35 = vpop.f32.mrb[43].mxu1 }
0x1f93   :  { %v3662_v33 = vadd.f32 %v4015_v6, %v3661_v35 }
0x1f94   :  { %v3673_v11 = vmul.f32 0.044715, %v3667_v8  ;;  %v3671_v56 = vmul.f32 0.5, %v3667_v8 }
0x1f95   :  { %v3672_v12 = vmul.f32 0.044715, %v3662_v33  ;;  %v3670_v41 = vmul.f32 0.5, %v3662_v33 }
0x1f96   :  { %v3675_v13 = vmul.f32 %v3673_v11, %v3667_v8 }
0x1f97   :  { %v3674_v14 = vmul.f32 %v3672_v12, %v3662_v33 }
0x1f98   :  { %v3677_v15 = vmul.f32 %v3675_v13, %v3667_v8 }
0x1f99   :  { %v3676_v39 = vmul.f32 %v3674_v14, %v3662_v33 }
0x1f9a   :  { %v3679_v45 = vadd.f32 %v3677_v15, %v3667_v8 }
0x1f9b   :  { %v3678_v10 = vadd.f32 %v3676_v39, %v3662_v33 }
0x1f9c   :  { %v3681_v16 = vmul.f32 0.7978846, %v3679_v45 }
0x1f9d   :  { %v3680_v17 = vmul.f32 0.7978846, %v3678_v10 }
0x1f9e   :  { %4625 = vtanh.f32 %v3681_v16 }
0x1f9f   :  { %4627 = vtanh.f32 %v3680_v17 }
0x1fa8   :  { %v4626_v18 = vpop.eup %4625 }
0x1fa9   :  { %v4628_v21 = vpop.eup %4627  ;;  %v3685_v22 = vadd.f32 1.0, %v4626_v18 }
0x1faa   :  { %v3684_v25 = vadd.f32 1.0, %v4628_v21 }
0x1fab   :  { %v3687_v58 = vmul.f32 %v3685_v22, %v3671_v56 }
0x1fac   :  { %v3686_v36 = vmul.f32 %v3684_v25, %v3670_v41 }
0x1fae   :  { %4418 = vmatprep.mubr.msk.f32.mxu0 %vm1864_vm5, %v3686_v36 }
0x1faf   :  { %4419 = vmatmul.mubr.msk.f32.vlgmr.msra.gmra.mrb[34].mxu0 %vm1864_vm5, %v3687_v58 }
0x2082   :  { %v4420_v61 = vpop.f32.mrb[34].mxu0 }
0x2083   :  { %v3779_v60 = vadd.f32 %v4420_v61, %v3700_v26  ;;  %v3773_v28 = vpop.f32.mrb[35].mxu0 }
0x2084   :  { %v3774_v0 = vadd.f32 %v3773_v28, %v3700_v26 }
0x2085   :  { %v3783_v29 = vadd.f32 %v3779_v60, %v3575_v54 }
0x2086   :  { %v3782_v27 = vadd.f32 %v3774_v0, %v3574_v52  ;;  %v3824_v52 = vld [vmem:[%s5448_s10 + $0x10] sm:$0xff] }
0x2087   :  { %v3787_v30 = vsel %vm72_vm0, %v3783_v29, 0.0  ;;  %v4516_v54 = vpack.c.bf16 %v3825_v53, %v3824_v52 }
0x2088   :  { %3788 = vadd.xlane.f32.xlu1 %v3787_v30  ;;  %v3784_v63 = vsel %vm72_vm0, %v3782_v27, 0.0 }
0x2089   :  { %3785 = vadd.xlane.f32.xlu0 %v3784_v63  ;;  %4517 = vmatprep.subr.bf16.mxu1 %v4516_v54 }
0x208a   :  { %4519 = vmatpush3.bf16.msra.mxu1 %v4516_v54 }
0x2115   :  { %v3789_v23 = vpop.xlane.xlu1 %3788 }
0x2116   :  { %v3791_v31 = vmul.f32 0.03125, %v3789_v23  ;;  %v3786_v24 = vpop.xlane.xlu0 %3785 }
0x2117   :  { %v3790_v32 = vmul.f32 0.03125, %v3786_v24 }
0x2118   :  { %v3793_v37 = vsub.f32 %v3783_v29, %v3791_v31 }
0x2119   :  { %v3792_v38 = vsub.f32 %v3782_v27, %v3790_v32 }
0x211a   :  { %v3795_v42 = vmul.f32 %v3793_v37, %v3793_v37 }
0x211b   :  { %v3794_v9 = vmul.f32 %v3792_v38, %v3792_v38 }
0x211c   :  { %v3799_v44 = vsel %vm72_vm0, %v3795_v42, 0.0 }
0x211d   :  { %3800 = vadd.xlane.f32.xlu1 %v3799_v44  ;;  %v3796_v46 = vsel %vm72_vm0, %v3794_v9, 0.0 }
0x211e   :  { %3797 = vadd.xlane.f32.xlu0 %v3796_v46 }
0x21aa   :  { %v3801_v19 = vpop.xlane.xlu1 %3800 }
0x21ab   :  { %v3803_v55 = vmul.f32 0.03125, %v3801_v19  ;;  %v3798_v57 = vpop.xlane.xlu0 %3797 }
0x21ac   :  { %v3802_v20 = vmul.f32 0.03125, %v3798_v57 }
0x21ad   :  { %v3805_v59 = vadd.f32 1e-12, %v3803_v55 }
0x21ae   :  { %v3804_v40 = vadd.f32 1e-12, %v3802_v20 }
0x21af   :  { %4629 = vrsqrt.f32 %v3805_v59 }
0x21b0   :  { %4631 = vrsqrt.f32 %v3804_v40 }
0x21b9   :  { %v4630_v34 = vpop.eup %4629 }
0x21ba   :  { %v4632_v1 = vpop.eup %4631  ;;  %v3809_v3 = vmul.f32 %v4630_v34, %v3793_v37 }
0x21bb   :  { %v3808_v4 = vmul.f32 %v4632_v1, %v3792_v38 }
0x21bc   :  { %v3815_v6 = vmul.f32 %v3813_v62, %v3809_v3 }
0x21bd   :  { %v3814_v7 = vmul.f32 %v3813_v62, %v3808_v4 }
0x21be   :  { %v3821_v35 = vadd.f32 %v3819_v5, %v3815_v6 }
0x21bf   :  { %v3820_v8 = vadd.f32 %v3819_v5, %v3814_v7 }
0x21c1   :  { %4429 = vmatprep.mubr.msk.f32.mxu1 %vm72_vm0, %v3820_v8 }
0x21c2   :  { %4430 = vmatmul.mubr.msk.f32.vlgmr.msra.gmra.mrb[44].mxu1 %vm72_vm0, %v3821_v35 }
0x2295   :  { %v4431_v33 = vpop.f32.mrb[44].mxu1 }
0x2296   :  { %v3911_v11 = vadd.f32 %v4431_v33, %v4028_v49  ;;  %v3905_v12 = vpop.f32.mrb[45].mxu1 }
0x2297   :  { %v3906_v48 = vadd.f32 %v4028_v49, %v3905_v12 }
0x2298   :  { %3915 = vst [vmem:[#allocation7 + $0x8] sm:$0xff] %v3911_v11 }
0x2299   :  { %3914 = vst [vmem:[#allocation7] sm:$0xff] %v3906_v48 }
0x229a   :  { %4688 = shalt.err (!%p4685_p6)
}
0x229b   :  { %s4689_s11 = scalar_lea.hbm %s5450_s12, 256 }
0x229c   :  { %p4690_p7 = scmp.ne.s32.totalorder %s5450_s12, %s4689_s11  ;;  %p4693_p8 = scmp.lt.u32.totalorder %s4689_s11, %s5450_s12 }
0x229e   :  { %p4695_p9 = pnand %p4693_p8, %p4690_p7 }
0x22a0   :  { %4698 = shalt.err (!%p4695_p9)
}
0x22a1   :  { %s5461_s27 = smov 128  }
0x22a2   :  { %3927 = dma.vmem_to_hbm [thread:$0]  %s3922_s23, 256, %s5450_s12, [#allocation4], %s5461_s27, %s5461_s27, %s5458_s4  }
0x22a3   :  { %4703 = dma.done.wait [#allocation4], 256  }
0x22a4   :  { %4704 = vsyncadd [#allocation4], 4294967040 }
0x22a5   :  { %3931 = vsyncpa [#allocation3], 1 }
0x22a6   :  { %3932 = vsyncpa [#allocation6], 1 }
0x22a7   :  { %3933 = vsyncpa [#allocation4], 1 }

</bundles_post_ra>
